<compile_context>
chip_gen: v5e
topology: v5e:2x2
jax: 0.10.0
libtpu: 0.0.40
codegen_flags: <defaults>
</compile_context>

<pallas_src>
import functools

import jax
import jax.numpy as jnp
from jax.experimental import pallas as pl
from jax.experimental.pallas import tpu as pltpu


def _round_up(x, m):
    return (x + m - 1) // m * m


def _cdiv(a, b):
    return -(-a // b)


# ----------------------------------------------------------------------------
# Kernel 1: dense layer  (X @ W + b) -> [ReLU] -> [Sigmoid], tiled over (M, N)
# ----------------------------------------------------------------------------
def _linear_kernel(x_ref, w_ref, b_ref, o_ref, *, relu, sigmoid):
    acc = jnp.dot(x_ref[...], w_ref[...], preferred_element_type=jnp.float32)
    acc = acc + b_ref[...]
    if relu:
        acc = jnp.maximum(acc, 0.0)
    if sigmoid:
        acc = jax.nn.sigmoid(acc)
    o_ref[...] = acc.astype(o_ref.dtype)


def linear_fused(x, w, b, *, relu=False, sigmoid=False, out_dtype=jnp.float32):
    M, K = x.shape
    K2, N = w.shape
    assert K == K2
    K_pad = _round_up(K, 128)

    # N tiling: bounds the resident weight block (v7x has only 64 MiB VMEM).
    N_pad = _round_up(N, 128)
    n_nt = _cdiv(N_pad, 1024)
    tile_n = _round_up(_cdiv(N_pad, n_nt), 128)
    N_pad = n_nt * tile_n

    # M tiling: never pad more than ~half a tile; force >=2 tiles when M is
    # large enough so the "parallel" grid can use both v7x TensorCores.
    n_mt = max(1, _cdiv(M, 512))
    if n_mt == 1 and M > 256:
        n_mt = 2
    tile_m = _round_up(_cdiv(M, n_mt), 16)            # bf16 sublane packing
    M_pad = n_mt * tile_m

    x_p = jnp.zeros((M_pad, K_pad), jnp.bfloat16).at[:M, :K].set(x.astype(jnp.bfloat16))
    w_p = jnp.zeros((K_pad, N_pad), jnp.bfloat16).at[:K, :N].set(w.astype(jnp.bfloat16))
    b_p = jnp.zeros((1, N_pad), jnp.float32).at[0, :N].set(b.astype(jnp.float32))

    kernel = functools.partial(_linear_kernel, relu=relu, sigmoid=sigmoid)
    out_bytes = 2 if out_dtype == jnp.bfloat16 else 4
    cost = pl.CostEstimate(
        flops=2 * M_pad * K_pad * N_pad,
        transcendentals=(M_pad * N_pad) if sigmoid else 0,
        bytes_accessed=(M_pad * K_pad + K_pad * N_pad) * 2
        + M_pad * N_pad * out_bytes + N_pad * 4,
    )
    out = pl.pallas_call(
        kernel,
        out_shape=jax.ShapeDtypeStruct((M_pad, N_pad), out_dtype),
        grid=(n_mt, n_nt),
        in_specs=[
            pl.BlockSpec((tile_m, K_pad), lambda i, j: (i, 0)),
            pl.BlockSpec((K_pad, tile_n), lambda i, j: (0, j)),
            pl.BlockSpec((1, tile_n), lambda i, j: (0, j)),
        ],
        out_specs=pl.BlockSpec((tile_m, tile_n), lambda i, j: (i, j)),
        compiler_params=pltpu.CompilerParams(
            dimension_semantics=("parallel", "parallel"),
            vmem_limit_bytes=32 * 1024 * 1024,
        ),
        cost_estimate=cost,
    )(x_p, w_p, b_p)
    return out[:M, :N]


# ----------------------------------------------------------------------------
# Kernel 2: fused ConvTranspose2d layer (all s*s sub-pixel phases in one call)
# ----------------------------------------------------------------------------
def _deconv_kernel(x_ref, w_ref, b_ref, shift_ref, o_ref, *,
                   taps, tile_h, n_w, cin, relu, sigmoid):
    """One (batch image, base-row block) step of a fused ConvTranspose layer.

    x_ref:     (1, Hp, Wp, cin)     whole padded activation of this image
    w_ref:     (n_taps*cin, N_pad)  phase-packed sub-pixel weight (bf16)
    b_ref:     (1, N_pad)           bias (eval-BN scale already folded in)
    shift_ref: (1, N_pad)           eval-BN shift (zeros when no BN)
    o_ref:     (1, tile_h, n_w, N_pad)
    """
    n_pad = o_ref.shape[-1]
    row0 = pl.program_id(1) * tile_h
    acc = jnp.zeros((tile_h, n_w, n_pad), jnp.float32)
    # In-kernel window gather: one shifted slab + one batched MXU dot per tap.
    for t, (oh, ow) in enumerate(taps):
        xt = x_ref[:, pl.ds(row0 + oh, tile_h), pl.ds(ow, n_w), :]
        xt = xt.reshape(tile_h, n_w, cin)                 # drop leading 1
        wt = w_ref[t * cin:(t + 1) * cin, :]              # (cin, N_pad)
        wt = jnp.broadcast_to(wt[None], (tile_h, cin, n_pad))
        acc = acc + jnp.einsum('hwc,hcn->hwn', xt, wt,
                               preferred_element_type=jnp.float32)
    acc = acc + b_ref[...]
    if relu:
        acc = jnp.maximum(acc, 0.0)
    acc = acc + shift_ref[...]
    if sigmoid:
        acc = jax.nn.sigmoid(acc)
    o_ref[...] = acc.reshape(1, tile_h, n_w, n_pad).astype(o_ref.dtype)


def conv_transpose_fused(x_nhwc, w, b, k, s, p, op, *, scale=None, shift=None,
                         relu=False, sigmoid=False, out_dtype=jnp.float32):
    """Fused ConvTranspose2d -> [ReLU] -> [BN(eval)] -> [Sigmoid].

    x_nhwc: (B, H, W, Cin); w: torch ConvTranspose2d layout (Cin, Cout, k, k).
    The s*s sub-pixel phases are evaluated in ONE pallas_call: phase weights
    are packed along N, tap windows are gathered in-kernel, and the phase
    interleave is one pixel-shuffle reshape/transpose at the end.
    """
    B, H, W, Cin = x_nhwc.shape
    Cout = w.shape[1]
    Ho = (H - 1) * s - 2 * p + k + op
    Wo = (W - 1) * s - 2 * p + k + op
    nH = _cdiv(Ho, s)
    nW = _cdiv(Wo, s)

    # Per-phase kernel taps (square kernel/stride => identical for H and W):
    # output row oh = s*i + r reads input row i + (r + p - kh)//s for every
    # kh in [0, k) with kh == (r + p) (mod s).
    phase_taps = []
    for r in range(s):
        rh = (r + p) % s
        phase_taps.append([(kh, (r + p - kh) // s) for kh in range(rh, k, s)])
    all_d = [d for taps_r in phase_taps for _, d in taps_r]
    d_min, d_max = min(all_d), max(all_d)
    win = d_max - d_min + 1                 # window extent per axis
    n_taps = win * win
    base = max(d_min, 0)                    # window start in the padded input

    # Phase-packed fused weight: K = win*win*Cin taps, N = s*s*Cout columns.
    N = s * s * Cout
    K = n_taps * Cin
    w_f = jnp.zeros((K, N), jnp.float32)
    for r_h in range(s):
        for kh, d_h in phase_taps[r_h]:
            for r_w in range(s):
                for kw, d_w in phase_taps[r_w]:
                    t = (d_h - d_min) * win + (d_w - d_min)
                    q = r_h * s + r_w
                    w_f = w_f.at[t * Cin:(t + 1) * Cin,
                                 q * Cout:(q + 1) * Cout].set(
                                     w[:, :, kh, kw].astype(jnp.float32))
    b_f = jnp.tile(b.astype(jnp.float32), s * s)
    if scale is not None:
        # Fold eval-BN scale into weight/bias (requires scale > 0, true for
        # gamma > 0 and running var >= 0): relu(v)*scale == relu(v*scale).
        sc = jnp.tile(scale.astype(jnp.float32), s * s)
        w_f = w_f * sc[None, :]
        b_f = b_f * sc
        shift_f = jnp.tile(shift.astype(jnp.float32), s * s)
    else:
        shift_f = jnp.zeros((N,), jnp.float32)

    N_pad = _round_up(N, 128)
    w_p = jnp.zeros((K, N_pad), jnp.bfloat16).at[:, :N].set(w_f.astype(jnp.bfloat16))
    b_p = jnp.zeros((1, N_pad), jnp.float32).at[0, :N].set(b_f)
    sh_p = jnp.zeros((1, N_pad), jnp.float32).at[0, :N].set(shift_f)

    # Base-row tiling: ~128 output sites per step; >=2 grid steps total so the
    # "parallel" grid can use both v7x TensorCores.
    tile_h = max(1, min(nH, max(1, 128 // max(nW, 1))))
    if B * _cdiv(nH, tile_h) < 2 and nH > 1:
        tile_h = _cdiv(nH, 2)
    n_rb = _cdiv(nH, tile_h)
    nHp = n_rb * tile_h

    # One boundary pad + bf16 cast per layer (hoisted out of any phase logic).
    pad_top = max(0, -d_min)
    pad_bot = max(0, (nHp + win - 1 + base) - (H + pad_top))
    pad_lft = pad_top
    pad_rgt = max(0, (nW + win - 1 + base) - (W + pad_lft))
    x_p = jnp.pad(x_nhwc.astype(jnp.bfloat16),
                  ((0, 0), (pad_top, pad_bot), (pad_lft, pad_rgt), (0, 0)))
    Hp, Wp = x_p.shape[1], x_p.shape[2]

    taps = [(dh + base, dw + base) for dh in range(win) for dw in range(win)]

    kernel = functools.partial(_deconv_kernel, taps=taps, tile_h=tile_h,
                               n_w=nW, cin=Cin, relu=relu, sigmoid=sigmoid)
    M_total = B * nHp * nW
    out_bytes = 2 if out_dtype == jnp.bfloat16 else 4
    cost = pl.CostEstimate(
        flops=2 * M_total * K * N_pad,
        transcendentals=(M_total * N_pad) if sigmoid else 0,
        bytes_accessed=x_p.size * 2 + K * N_pad * 2
        + M_total * N_pad * out_bytes + 2 * N_pad * 4,
    )
    out = pl.pallas_call(
        kernel,
        out_shape=jax.ShapeDtypeStruct((B, nHp, nW, N_pad), out_dtype),
        grid=(B, n_rb),
        in_specs=[
            pl.BlockSpec((1, Hp, Wp, Cin), lambda bi, ri: (bi, 0, 0, 0)),
            pl.BlockSpec((K, N_pad), lambda bi, ri: (0, 0)),
            pl.BlockSpec((1, N_pad), lambda bi, ri: (0, 0)),
            pl.BlockSpec((1, N_pad), lambda bi, ri: (0, 0)),
        ],
        out_specs=pl.BlockSpec((1, tile_h, nW, N_pad),
                               lambda bi, ri: (bi, ri, 0, 0)),
        compiler_params=pltpu.CompilerParams(
            dimension_semantics=("parallel", "parallel"),
            vmem_limit_bytes=32 * 1024 * 1024,
        ),
        cost_estimate=cost,
    )(x_p, w_p, b_p, sh_p)

    # Single lane-dense pixel-shuffle interleave (replaces s*s strided scatters).
    y = out[:, :nH, :, :N].reshape(B, nH, nW, s, s, Cout)
    y = jnp.transpose(y, (0, 1, 3, 2, 4, 5)).reshape(B, nH * s, nW * s, Cout)
    return y[:, :Ho, :Wo, :]


# ----------------------------------------------------------------------------
# Parameter init (deterministic, mirrors Decoder.__init__ shapes; torch layouts)
# ----------------------------------------------------------------------------
def init_decoder_params(key, input_shape, conv_filters, conv_kernels,
                        conv_strides, latent_dim):
    H, W, C_in = input_shape
    h, w = H, W
    for k, s in zip(conv_kernels, conv_strides):
        p = (k - 1) // 2
        h = (h + 2 * p - k) // s + 1
        w = (w + 2 * p - k) // s + 1
    reshape_size = (conv_filters[-1], h, w)           # (C, H, W) like PyTorch
    flatten_size = conv_filters[-1] * h * w

    keys = iter(jax.random.split(key, 64))
    params = {
        'reshape_size': reshape_size,
        'dense_w': 0.05 * jax.random.normal(next(keys), (flatten_size, latent_dim), jnp.float32),
        'dense_b': 0.05 * jax.random.normal(next(keys), (flatten_size,), jnp.float32),
        'conv': [],
    }
    filters = conv_filters[::-1]
    kernels = conv_kernels[::-1]
    strides = conv_strides[::-1]
    for i in range(len(filters)):
        cin = filters[i]
        cout = filters[i + 1] if i < len(filters) - 1 else C_in
        k, s = kernels[i], strides[i]
        layer = {
            'w': 0.1 * jax.random.normal(next(keys), (cin, cout, k, k), jnp.float32),
            'b': 0.1 * jax.random.normal(next(keys), (cout,), jnp.float32),
            'k': k, 's': s, 'p': (k - 1) // 2,
            'op': s - 1 if s > 1 else 0,
            'last': i == len(filters) - 1,
        }
        if not layer['last']:
            layer['bn_gamma'] = jnp.ones((cout,), jnp.float32)
            layer['bn_beta'] = jnp.zeros((cout,), jnp.float32)
            layer['bn_mean'] = jnp.zeros((cout,), jnp.float32)
            layer['bn_var'] = jnp.ones((cout,), jnp.float32)
        params['conv'].append(layer)
    return params


# ----------------------------------------------------------------------------
# Decoder forward (Pallas path)
# ----------------------------------------------------------------------------
def decoder_forward(params, z):
    B = z.shape[0]
    C_r, H_r, W_r = params['reshape_size']
    flat = C_r * H_r * W_r

    # Fold the PyTorch CHW-flatten order -> HWC into a one-time permutation of
    # the dense weight/bias rows; no activation transpose runs between kernels.
    w_hwc = params['dense_w'].reshape(C_r, H_r, W_r, -1).transpose(1, 2, 0, 3).reshape(flat, -1)
    b_hwc = params['dense_b'].reshape(C_r, H_r, W_r).transpose(1, 2, 0).reshape(flat)

    # decoder_dense: Linear -> ReLU (-> Dropout identity in eval), bf16 output.
    x = linear_fused(z, w_hwc.T, b_hwc, relu=True, out_dtype=jnp.bfloat16)
    x = x.reshape(B, H_r, W_r, C_r)                   # NHWC

    for layer in params['conv']:
        if layer['last']:
            # ConvTranspose2d -> Sigmoid (final layer, f32 output)
            x = conv_transpose_fused(
                x, layer['w'], layer['b'], layer['k'], layer['s'],
                layer['p'], layer['op'], sigmoid=True, out_dtype=jnp.float32)
        else:
            # ConvTranspose2d -> ReLU -> BatchNorm2d(eval) (-> Dropout2d identity)
            scale = layer['bn_gamma'] * jax.lax.rsqrt(layer['bn_var'] + 1e-5)
            shift = layer['bn_beta'] - layer['bn_mean'] * scale
            x = conv_transpose_fused(
                x, layer['w'], layer['b'], layer['k'], layer['s'],
                layer['p'], layer['op'], scale=scale, shift=shift, relu=True,
                out_dtype=jnp.bfloat16)

    return jnp.transpose(x, (0, 3, 1, 2))             # NHWC -> NCHW (PyTorch)


# ----------------------------------------------------------------------------
# Pure-JAX f32 reference (XLA convs) for correctness checking
# ----------------------------------------------------------------------------
def decoder_reference(params, z):
    C_r, H_r, W_r = params['reshape_size']
    x = jnp.maximum(z @ params['dense_w'].T + params['dense_b'], 0.0)
    x = x.reshape(-1, C_r, H_r, W_r)                  # NCHW, PyTorch view order
    for layer in params['conv']:
        k, s, p, op = layer['k'], layer['s'], layer['p'], layer['op']
        w_flip = layer['w'][:, :, ::-1, ::-1]         # (Cin, Cout, k, k) flipped
        rhs = jnp.transpose(w_flip, (1, 0, 2, 3))     # OIHW
        y = jax.lax.conv_general_dilated(
            x, rhs, window_strides=(1, 1),
            padding=[(k - 1 - p, k - 1 - p + op)] * 2,
            lhs_dilation=(s, s),
            dimension_numbers=('NCHW', 'OIHW', 'NCHW'))
        y = y + layer['b'].reshape(1, -1, 1, 1)
        if layer['last']:
            x = jax.nn.sigmoid(y)
        else:
            y = jnp.maximum(y, 0.0)
            scale = layer['bn_gamma'] / jnp.sqrt(layer['bn_var'] + 1e-5)
            shift = layer['bn_beta'] - layer['bn_mean'] * scale
            x = y * scale.reshape(1, -1, 1, 1) + shift.reshape(1, -1, 1, 1)
    return x


# ----------------------------------------------------------------------------
if __name__ == "__main__":
    # Small, self-consistent configuration.
    input_shape = (16, 16, 4)       # (H, W, C)
    conv_filters = [8, 16]
    conv_kernels = [3, 3]
    conv_strides = [2, 2]
    latent_dim = 32
    batch = 2

    key = jax.random.PRNGKey(0)
    kp, kz = jax.random.split(key)
    params = init_decoder_params(kp, input_shape, conv_filters, conv_kernels,
                                 conv_strides, latent_dim)
    z = jax.random.normal(kz, (batch, latent_dim), jnp.float32)

    fwd = jax.jit(lambda zz: decoder_forward(params, zz))
    out = jax.block_until_ready(fwd(z))
    ref = jax.block_until_ready(decoder_reference(params, z))

    H, W, C = input_shape
    assert out.shape == (batch, C, H, W), out.shape
    assert bool(jnp.all(jnp.isfinite(out)))
    assert bool(jnp.all((out >= 0.0) & (out <= 1.0)))   # sigmoid output range
    # Documented accuracy contract: bf16 MXU operands, f32 accumulation/epilogue.
    max_err = float(jnp.max(jnp.abs(out - ref)))
    assert max_err < 3e-2, f"mismatch vs pure-JAX reference: {max_err}"
    print("KERNEL_OK")
</pallas_src>

<mosaic_0001>
module attributes {stable_mosaic.version = 11 : i64} {
  func.func @_linear_kernel(%arg0: i32, %arg1: i32, %arg2: memref<16x128xbf16, #tpu.memory_space<vmem>>, %arg3: memref<128x256xbf16, #tpu.memory_space<vmem>>, %arg4: memref<1x256xf32, #tpu.memory_space<vmem>>, %arg5: memref<16x256xbf16, #tpu.memory_space<vmem>>) attributes {dimension_semantics = [#tpu.dimension_semantics<parallel>, #tpu.dimension_semantics<parallel>], iteration_bounds = array<i64: 1, 1>, scalar_prefetch = 0 : i64, scratch_operands = 0 : i64, tpu.core_type = #tpu.core_type<tc>, window_params = [{transform_indices = @transform_0, window_bounds = array<i64: 16, 128>}, {transform_indices = @transform_1, window_bounds = array<i64: 128, 256>}, {transform_indices = @transform_2, window_bounds = array<i64: 1, 256>}, {transform_indices = @transform_3, window_bounds = array<i64: 16, 256>}]} {
    %c0 = arith.constant 0 : index
    %c0_0 = arith.constant 0 : index
    %0 = vector.load %arg2[%c0, %c0_0] : memref<16x128xbf16, #tpu.memory_space<vmem>>, vector<16x128xbf16>
    %c0_1 = arith.constant 0 : index
    %c0_2 = arith.constant 0 : index
    %1 = vector.load %arg3[%c0_1, %c0_2] : memref<128x256xbf16, #tpu.memory_space<vmem>>, vector<128x256xbf16>
    %cst = arith.constant dense<0.000000e+00> : vector<16x256xf32>
    %2 = tpu.matmul %0, %1, %cst {dimension_numbers = #tpu.dot_dimension_numbers<[1], [0], [0], [1], [0, 0, 1, 1], [], []>} : vector<16x128xbf16>, vector<128x256xbf16>, vector<16x256xf32> -> vector<16x256xf32>
    %c0_3 = arith.constant 0 : index
    %c0_4 = arith.constant 0 : index
    %3 = vector.load %arg4[%c0_3, %c0_4] : memref<1x256xf32, #tpu.memory_space<vmem>>, vector<1x256xf32>
    %4 = vector.broadcast %3 : vector<1x256xf32> to vector<16x256xf32>
    %5 = arith.addf %2, %4 : vector<16x256xf32>
    %cst_5 = arith.constant 0.000000e+00 : f32
    %6 = vector.broadcast %cst_5 : f32 to vector<16x256xf32>
    %7 = arith.maximumf %5, %6 : vector<16x256xf32>
    %8 = arith.truncf %7 : vector<16x256xf32> to vector<16x256xbf16>
    %c0_6 = arith.constant 0 : index
    %c0_7 = arith.constant 0 : index
    %9 = vector.load %arg5[%c0_6, %c0_7] : memref<16x256xbf16, #tpu.memory_space<vmem>>, vector<16x256xbf16>
    tpu.vector_store %arg5[%c0_6, %c0_7], %8 {strides = array<i32>} : memref<16x256xbf16, #tpu.memory_space<vmem>>, vector<16x256xbf16>,
    return
  }
  func.func @transform_0(%arg0: i32, %arg1: i32) -> (i32, i32) {
    %c0_i32 = arith.constant 0 : i32
    %c0_i32_0 = arith.constant 0 : i32
    return %arg0, %c0_i32 : i32, i32
  }
  func.func @transform_1(%arg0: i32, %arg1: i32) -> (i32, i32) {
    %c0_i32 = arith.constant 0 : i32
    %c0_i32_0 = arith.constant 0 : i32
    return %c0_i32, %arg1 : i32, i32
  }
  func.func @transform_2(%arg0: i32, %arg1: i32) -> (i32, i32) {
    %c0_i32 = arith.constant 0 : i32
    %c0_i32_0 = arith.constant 0 : i32
    return %c0_i32, %arg1 : i32, i32
  }
  func.func @transform_3(%arg0: i32, %arg1: i32) -> (i32, i32) {
    %c0_i32 = arith.constant 0 : i32
    return %arg0, %arg1 : i32, i32
  }
}

module attributes {stable_mosaic.version = 11 : i64} {
  func.func @_deconv_kernel(%arg0: i32, %arg1: i32, %arg2: memref<1x5x5x16xbf16, #tpu.memory_space<vmem>>, %arg3: memref<64x128xbf16, #tpu.memory_space<vmem>>, %arg4: memref<1x128xf32, #tpu.memory_space<vmem>>, %arg5: memref<1x128xf32, #tpu.memory_space<vmem>>, %arg6: memref<1x4x4x128xbf16, #tpu.memory_space<vmem>>) attributes {dimension_semantics = [#tpu.dimension_semantics<parallel>, #tpu.dimension_semantics<parallel>], iteration_bounds = array<i64: 2, 1>, scalar_prefetch = 0 : i64, scratch_operands = 0 : i64, tpu.core_type = #tpu.core_type<tc>, window_params = [{transform_indices = @transform_0, window_bounds = array<i64: 1, 5, 5, 16>}, {pipeline_mode = #tpu.pipeline_mode<synchronous>, transform_indices = @transform_1, window_bounds = array<i64: 64, 128>}, {pipeline_mode = #tpu.pipeline_mode<synchronous>, transform_indices = @transform_2, window_bounds = array<i64: 1, 128>}, {pipeline_mode = #tpu.pipeline_mode<synchronous>, transform_indices = @transform_3, window_bounds = array<i64: 1, 128>}, {transform_indices = @transform_4, window_bounds = array<i64: 1, 4, 4, 128>}]} {
    %c4_i32 = arith.constant 4 : i32
    %0 = arith.muli %arg1, %c4_i32 : i32
    %cst = arith.constant 0.000000e+00 : f32
    %1 = vector.broadcast %cst : f32 to vector<4x4x128xf32>
    %c0_i32 = arith.constant 0 : i32
    %2 = arith.addi %0, %c0_i32 : i32
    %c0 = arith.constant 0 : index
    %3 = arith.index_cast %2 : i32 to index
    %c0_0 = arith.constant 0 : index
    %c0_1 = arith.constant 0 : index
    %4 = vector.load %arg2[%c0, %3, %c0_0, %c0_1] : memref<1x5x5x16xbf16, #tpu.memory_space<vmem>>, vector<1x4x4x16xbf16>
    %5 = vector.shape_cast %4 : vector<1x4x4x16xbf16> to vector<4x4x16xbf16>
    %c0_2 = arith.constant 0 : index
    %c0_3 = arith.constant 0 : index
    %6 = vector.load %arg3[%c0_2, %c0_3] : memref<64x128xbf16, #tpu.memory_space<vmem>>, vector<16x128xbf16>
    %7 = vector.shape_cast %6 : vector<16x128xbf16> to vector<1x16x128xbf16>
    %8 = vector.shape_cast %7 : vector<1x16x128xbf16> to vector<1x16x128xbf16>
    %9 = vector.broadcast %8 : vector<1x16x128xbf16> to vector<4x16x128xbf16>
    "tpu.trace_start"() <{level = 10 : i32, message = "hwc,hcn->hwn"}> : () -> ()
    %cst_4 = arith.constant dense<0.000000e+00> : vector<4x4x128xf32>
    %10 = tpu.matmul %5, %9, %cst_4 {dimension_numbers = #tpu.dot_dimension_numbers<[2], [1], [1], [2], [0, 0, 0, 1, 1, 2], [0], [0]>} : vector<4x4x16xbf16>, vector<4x16x128xbf16>, vector<4x4x128xf32> -> vector<4x4x128xf32>
    "tpu.trace_stop"() : () -> ()
    %11 = arith.addf %1, %10 : vector<4x4x128xf32>
    %c0_i32_5 = arith.constant 0 : i32
    %12 = arith.addi %0, %c0_i32_5 : i32
    %c0_6 = arith.constant 0 : index
    %13 = arith.index_cast %12 : i32 to index
    %c1 = arith.constant 1 : index
    %c0_7 = arith.constant 0 : index
    %14 = vector.load %arg2[%c0_6, %13, %c1, %c0_7] : memref<1x5x5x16xbf16, #tpu.memory_space<vmem>>, vector<1x4x4x16xbf16>
    %15 = vector.shape_cast %14 : vector<1x4x4x16xbf16> to vector<4x4x16xbf16>
    %c16 = arith.constant 16 : index
    %c0_8 = arith.constant 0 : index
    %16 = vector.load %arg3[%c16, %c0_8] : memref<64x128xbf16, #tpu.memory_space<vmem>>, vector<16x128xbf16>
    %17 = vector.shape_cast %16 : vector<16x128xbf16> to vector<1x16x128xbf16>
    %18 = vector.shape_cast %17 : vector<1x16x128xbf16> to vector<1x16x128xbf16>
    %19 = vector.broadcast %18 : vector<1x16x128xbf16> to vector<4x16x128xbf16>
    "tpu.trace_start"() <{level = 10 : i32, message = "hwc,hcn->hwn"}> : () -> ()
    %cst_9 = arith.constant dense<0.000000e+00> : vector<4x4x128xf32>
    %20 = tpu.matmul %15, %19, %cst_9 {dimension_numbers = #tpu.dot_dimension_numbers<[2], [1], [1], [2], [0, 0, 0, 1, 1, 2], [0], [0]>} : vector<4x4x16xbf16>, vector<4x16x128xbf16>, vector<4x4x128xf32> -> vector<4x4x128xf32>
    "tpu.trace_stop"() : () -> ()
    %21 = arith.addf %11, %20 : vector<4x4x128xf32>
    %c1_i32 = arith.constant 1 : i32
    %22 = arith.addi %0, %c1_i32 : i32
    %c0_10 = arith.constant 0 : index
    %23 = arith.index_cast %22 : i32 to index
    %c0_11 = arith.constant 0 : index
    %c0_12 = arith.constant 0 : index
    %24 = vector.load %arg2[%c0_10, %23, %c0_11, %c0_12] : memref<1x5x5x16xbf16, #tpu.memory_space<vmem>>, vector<1x4x4x16xbf16>
    %25 = vector.shape_cast %24 : vector<1x4x4x16xbf16> to vector<4x4x16xbf16>
    %c32 = arith.constant 32 : index
    %c0_13 = arith.constant 0 : index
    %26 = vector.load %arg3[%c32, %c0_13] : memref<64x128xbf16, #tpu.memory_space<vmem>>, vector<16x128xbf16>
    %27 = vector.shape_cast %26 : vector<16x128xbf16> to vector<1x16x128xbf16>
    %28 = vector.shape_cast %27 : vector<1x16x128xbf16> to vector<1x16x128xbf16>
    %29 = vector.broadcast %28 : vector<1x16x128xbf16> to vector<4x16x128xbf16>
    "tpu.trace_start"() <{level = 10 : i32, message = "hwc,hcn->hwn"}> : () -> ()
    %cst_14 = arith.constant dense<0.000000e+00> : vector<4x4x128xf32>
    %30 = tpu.matmul %25, %29, %cst_14 {dimension_numbers = #tpu.dot_dimension_numbers<[2], [1], [1], [2], [0, 0, 0, 1, 1, 2], [0], [0]>} : vector<4x4x16xbf16>, vector<4x16x128xbf16>, vector<4x4x128xf32> -> vector<4x4x128xf32>
    "tpu.trace_stop"() : () -> ()
    %31 = arith.addf %21, %30 : vector<4x4x128xf32>
    %c1_i32_15 = arith.constant 1 : i32
    %32 = arith.addi %0, %c1_i32_15 : i32
    %c0_16 = arith.constant 0 : index
    %33 = arith.index_cast %32 : i32 to index
    %c1_17 = arith.constant 1 : index
    %c0_18 = arith.constant 0 : index
    %34 = vector.load %arg2[%c0_16, %33, %c1_17, %c0_18] : memref<1x5x5x16xbf16, #tpu.memory_space<vmem>>, vector<1x4x4x16xbf16>
    %35 = vector.shape_cast %34 : vector<1x4x4x16xbf16> to vector<4x4x16xbf16>
    %c48 = arith.constant 48 : index
    %c0_19 = arith.constant 0 : index
    %36 = vector.load %arg3[%c48, %c0_19] : memref<64x128xbf16, #tpu.memory_space<vmem>>, vector<16x128xbf16>
    %37 = vector.shape_cast %36 : vector<16x128xbf16> to vector<1x16x128xbf16>
    %38 = vector.shape_cast %37 : vector<1x16x128xbf16> to vector<1x16x128xbf16>
    %39 = vector.broadcast %38 : vector<1x16x128xbf16> to vector<4x16x128xbf16>
    "tpu.trace_start"() <{level = 10 : i32, message = "hwc,hcn->hwn"}> : () -> ()
    %cst_20 = arith.constant dense<0.000000e+00> : vector<4x4x128xf32>
    %40 = tpu.matmul %35, %39, %cst_20 {dimension_numbers = #tpu.dot_dimension_numbers<[2], [1], [1], [2], [0, 0, 0, 1, 1, 2], [0], [0]>} : vector<4x4x16xbf16>, vector<4x16x128xbf16>, vector<4x4x128xf32> -> vector<4x4x128xf32>
    "tpu.trace_stop"() : () -> ()
    %41 = arith.addf %31, %40 : vector<4x4x128xf32>
    %c0_21 = arith.constant 0 : index
    %c0_22 = arith.constant 0 : index
    %42 = vector.load %arg4[%c0_21, %c0_22] : memref<1x128xf32, #tpu.memory_space<vmem>>, vector<1x128xf32>
    %43 = vector.shape_cast %42 : vector<1x128xf32> to vector<1x1x128xf32>
    %44 = vector.broadcast %43 : vector<1x1x128xf32> to vector<4x4x128xf32>
    %45 = arith.addf %41, %44 : vector<4x4x128xf32>
    %cst_23 = arith.constant 0.000000e+00 : f32
    %46 = vector.broadcast %cst_23 : f32 to vector<4x4x128xf32>
    %47 = arith.maximumf %45, %46 : vector<4x4x128xf32>
    %c0_24 = arith.constant 0 : index
    %c0_25 = arith.constant 0 : index
    %48 = vector.load %arg5[%c0_24, %c0_25] : memref<1x128xf32, #tpu.memory_space<vmem>>, vector<1x128xf32>
    %49 = vector.shape_cast %48 : vector<1x128xf32> to vector<1x1x128xf32>
    %50 = vector.broadcast %49 : vector<1x1x128xf32> to vector<4x4x128xf32>
    %51 = arith.addf %47, %50 : vector<4x4x128xf32>
    %52 = vector.shape_cast %51 : vector<4x4x128xf32> to vector<1x4x4x128xf32>
    %53 = arith.truncf %52 : vector<1x4x4x128xf32> to vector<1x4x4x128xbf16>
    %c0_26 = arith.constant 0 : index
    %c0_27 = arith.constant 0 : index
    %c0_28 = arith.constant 0 : index
    %c0_29 = arith.constant 0 : index
    %54 = vector.load %arg6[%c0_26, %c0_27, %c0_28, %c0_29] : memref<1x4x4x128xbf16, #tpu.memory_space<vmem>>, vector<1x4x4x128xbf16>
    tpu.vector_store %arg6[%c0_26, %c0_27, %c0_28, %c0_29], %53 {strides = array<i32>} : memref<1x4x4x128xbf16, #tpu.memory_space<vmem>>, vector<1x4x4x128xbf16>,
    return
  }
  func.func @transform_0(%arg0: i32, %arg1: i32) -> (i32, i32, i32, i32) {
    %c0_i32 = arith.constant 0 : i32
    %c0_i32_0 = arith.constant 0 : i32
    %c0_i32_1 = arith.constant 0 : i32
    %c0_i32_2 = arith.constant 0 : i32
    return %arg0, %c0_i32, %c0_i32_0, %c0_i32_1 : i32, i32, i32, i32
  }
  func.func @transform_1(%arg0: i32, %arg1: i32) -> (i32, i32) {
    %c0_i32 = arith.constant 0 : i32
    %c0_i32_0 = arith.constant 0 : i32
    %c0_i32_1 = arith.constant 0 : i32
    return %c0_i32, %c0_i32_0 : i32, i32
  }
  func.func @transform_2(%arg0: i32, %arg1: i32) -> (i32, i32) {
    %c0_i32 = arith.constant 0 : i32
    %c0_i32_0 = arith.constant 0 : i32
    %c0_i32_1 = arith.constant 0 : i32
    return %c0_i32, %c0_i32_0 : i32, i32
  }
  func.func @transform_3(%arg0: i32, %arg1: i32) -> (i32, i32) {
    %c0_i32 = arith.constant 0 : i32
    %c0_i32_0 = arith.constant 0 : i32
    %c0_i32_1 = arith.constant 0 : i32
    return %c0_i32, %c0_i32_0 : i32, i32
  }
  func.func @transform_4(%arg0: i32, %arg1: i32) -> (i32, i32, i32, i32) {
    %c0_i32 = arith.constant 0 : i32
    %c0_i32_0 = arith.constant 0 : i32
    %c0_i32_1 = arith.constant 0 : i32
    return %arg0, %arg1, %c0_i32, %c0_i32_0 : i32, i32, i32, i32
  }
}

module attributes {stable_mosaic.version = 11 : i64} {
  func.func @_deconv_kernel(%arg0: i32, %arg1: i32, %arg2: memref<1x9x9x8xbf16, #tpu.memory_space<vmem>>, %arg3: memref<32x128xbf16, #tpu.memory_space<vmem>>, %arg4: memref<1x128xf32, #tpu.memory_space<vmem>>, %arg5: memref<1x128xf32, #tpu.memory_space<vmem>>, %arg6: memref<1x8x8x128xf32, #tpu.memory_space<vmem>>) attributes {dimension_semantics = [#tpu.dimension_semantics<parallel>, #tpu.dimension_semantics<parallel>], iteration_bounds = array<i64: 2, 1>, scalar_prefetch = 0 : i64, scratch_operands = 0 : i64, tpu.core_type = #tpu.core_type<tc>, window_params = [{transform_indices = @transform_0, window_bounds = array<i64: 1, 9, 9, 8>}, {pipeline_mode = #tpu.pipeline_mode<synchronous>, transform_indices = @transform_1, window_bounds = array<i64: 32, 128>}, {pipeline_mode = #tpu.pipeline_mode<synchronous>, transform_indices = @transform_2, window_bounds = array<i64: 1, 128>}, {pipeline_mode = #tpu.pipeline_mode<synchronous>, transform_indices = @transform_3, window_bounds = array<i64: 1, 128>}, {transform_indices = @transform_4, window_bounds = array<i64: 1, 8, 8, 128>}]} {
    %c8_i32 = arith.constant 8 : i32
    %0 = arith.muli %arg1, %c8_i32 : i32
    %cst = arith.constant 0.000000e+00 : f32
    %1 = vector.broadcast %cst : f32 to vector<8x8x128xf32>
    %c0_i32 = arith.constant 0 : i32
    %2 = arith.addi %0, %c0_i32 : i32
    %c0 = arith.constant 0 : index
    %3 = arith.index_cast %2 : i32 to index
    %c0_0 = arith.constant 0 : index
    %c0_1 = arith.constant 0 : index
    %4 = vector.load %arg2[%c0, %3, %c0_0, %c0_1] : memref<1x9x9x8xbf16, #tpu.memory_space<vmem>>, vector<1x8x8x8xbf16>
    %5 = vector.shape_cast %4 : vector<1x8x8x8xbf16> to vector<8x8x8xbf16>
    %c0_2 = arith.constant 0 : index
    %c0_3 = arith.constant 0 : index
    %6 = vector.load %arg3[%c0_2, %c0_3] : memref<32x128xbf16, #tpu.memory_space<vmem>>, vector<8x128xbf16>
    %7 = vector.shape_cast %6 : vector<8x128xbf16> to vector<1x8x128xbf16>
    %8 = vector.shape_cast %7 : vector<1x8x128xbf16> to vector<1x8x128xbf16>
    %9 = vector.broadcast %8 : vector<1x8x128xbf16> to vector<8x8x128xbf16>
    "tpu.trace_start"() <{level = 10 : i32, message = "hwc,hcn->hwn"}> : () -> ()
    %cst_4 = arith.constant dense<0.000000e+00> : vector<8x8x128xf32>
    %10 = tpu.matmul %5, %9, %cst_4 {dimension_numbers = #tpu.dot_dimension_numbers<[2], [1], [1], [2], [0, 0, 0, 1, 1, 2], [0], [0]>} : vector<8x8x8xbf16>, vector<8x8x128xbf16>, vector<8x8x128xf32> -> vector<8x8x128xf32>
    "tpu.trace_stop"() : () -> ()
    %11 = arith.addf %1, %10 : vector<8x8x128xf32>
    %c0_i32_5 = arith.constant 0 : i32
    %12 = arith.addi %0, %c0_i32_5 : i32
    %c0_6 = arith.constant 0 : index
    %13 = arith.index_cast %12 : i32 to index
    %c1 = arith.constant 1 : index
    %c0_7 = arith.constant 0 : index
    %14 = vector.load %arg2[%c0_6, %13, %c1, %c0_7] : memref<1x9x9x8xbf16, #tpu.memory_space<vmem>>, vector<1x8x8x8xbf16>
    %15 = vector.shape_cast %14 : vector<1x8x8x8xbf16> to vector<8x8x8xbf16>
    %c8 = arith.constant 8 : index
    %c0_8 = arith.constant 0 : index
    %16 = vector.load %arg3[%c8, %c0_8] : memref<32x128xbf16, #tpu.memory_space<vmem>>, vector<8x128xbf16>
    %17 = vector.shape_cast %16 : vector<8x128xbf16> to vector<1x8x128xbf16>
    %18 = vector.shape_cast %17 : vector<1x8x128xbf16> to vector<1x8x128xbf16>
    %19 = vector.broadcast %18 : vector<1x8x128xbf16> to vector<8x8x128xbf16>
    "tpu.trace_start"() <{level = 10 : i32, message = "hwc,hcn->hwn"}> : () -> ()
    %cst_9 = arith.constant dense<0.000000e+00> : vector<8x8x128xf32>
    %20 = tpu.matmul %15, %19, %cst_9 {dimension_numbers = #tpu.dot_dimension_numbers<[2], [1], [1], [2], [0, 0, 0, 1, 1, 2], [0], [0]>} : vector<8x8x8xbf16>, vector<8x8x128xbf16>, vector<8x8x128xf32> -> vector<8x8x128xf32>
    "tpu.trace_stop"() : () -> ()
    %21 = arith.addf %11, %20 : vector<8x8x128xf32>
    %c1_i32 = arith.constant 1 : i32
    %22 = arith.addi %0, %c1_i32 : i32
    %c0_10 = arith.constant 0 : index
    %23 = arith.index_cast %22 : i32 to index
    %c0_11 = arith.constant 0 : index
    %c0_12 = arith.constant 0 : index
    %24 = vector.load %arg2[%c0_10, %23, %c0_11, %c0_12] : memref<1x9x9x8xbf16, #tpu.memory_space<vmem>>, vector<1x8x8x8xbf16>
    %25 = vector.shape_cast %24 : vector<1x8x8x8xbf16> to vector<8x8x8xbf16>
    %c16 = arith.constant 16 : index
    %c0_13 = arith.constant 0 : index
    %26 = vector.load %arg3[%c16, %c0_13] : memref<32x128xbf16, #tpu.memory_space<vmem>>, vector<8x128xbf16>
    %27 = vector.shape_cast %26 : vector<8x128xbf16> to vector<1x8x128xbf16>
    %28 = vector.shape_cast %27 : vector<1x8x128xbf16> to vector<1x8x128xbf16>
    %29 = vector.broadcast %28 : vector<1x8x128xbf16> to vector<8x8x128xbf16>
    "tpu.trace_start"() <{level = 10 : i32, message = "hwc,hcn->hwn"}> : () -> ()
    %cst_14 = arith.constant dense<0.000000e+00> : vector<8x8x128xf32>
    %30 = tpu.matmul %25, %29, %cst_14 {dimension_numbers = #tpu.dot_dimension_numbers<[2], [1], [1], [2], [0, 0, 0, 1, 1, 2], [0], [0]>} : vector<8x8x8xbf16>, vector<8x8x128xbf16>, vector<8x8x128xf32> -> vector<8x8x128xf32>
    "tpu.trace_stop"() : () -> ()
    %31 = arith.addf %21, %30 : vector<8x8x128xf32>
    %c1_i32_15 = arith.constant 1 : i32
    %32 = arith.addi %0, %c1_i32_15 : i32
    %c0_16 = arith.constant 0 : index
    %33 = arith.index_cast %32 : i32 to index
    %c1_17 = arith.constant 1 : index
    %c0_18 = arith.constant 0 : index
    %34 = vector.load %arg2[%c0_16, %33, %c1_17, %c0_18] : memref<1x9x9x8xbf16, #tpu.memory_space<vmem>>, vector<1x8x8x8xbf16>
    %35 = vector.shape_cast %34 : vector<1x8x8x8xbf16> to vector<8x8x8xbf16>
    %c24 = arith.constant 24 : index
    %c0_19 = arith.constant 0 : index
    %36 = vector.load %arg3[%c24, %c0_19] : memref<32x128xbf16, #tpu.memory_space<vmem>>, vector<8x128xbf16>
    %37 = vector.shape_cast %36 : vector<8x128xbf16> to vector<1x8x128xbf16>
    %38 = vector.shape_cast %37 : vector<1x8x128xbf16> to vector<1x8x128xbf16>
    %39 = vector.broadcast %38 : vector<1x8x128xbf16> to vector<8x8x128xbf16>
    "tpu.trace_start"() <{level = 10 : i32, message = "hwc,hcn->hwn"}> : () -> ()
    %cst_20 = arith.constant dense<0.000000e+00> : vector<8x8x128xf32>
    %40 = tpu.matmul %35, %39, %cst_20 {dimension_numbers = #tpu.dot_dimension_numbers<[2], [1], [1], [2], [0, 0, 0, 1, 1, 2], [0], [0]>} : vector<8x8x8xbf16>, vector<8x8x128xbf16>, vector<8x8x128xf32> -> vector<8x8x128xf32>
    "tpu.trace_stop"() : () -> ()
    %41 = arith.addf %31, %40 : vector<8x8x128xf32>
    %c0_21 = arith.constant 0 : index
    %c0_22 = arith.constant 0 : index
    %42 = vector.load %arg4[%c0_21, %c0_22] : memref<1x128xf32, #tpu.memory_space<vmem>>, vector<1x128xf32>
    %43 = vector.shape_cast %42 : vector<1x128xf32> to vector<1x1x128xf32>
    %44 = vector.broadcast %43 : vector<1x1x128xf32> to vector<8x8x128xf32>
    %45 = arith.addf %41, %44 : vector<8x8x128xf32>
    %c0_23 = arith.constant 0 : index
    %c0_24 = arith.constant 0 : index
    %46 = vector.load %arg5[%c0_23, %c0_24] : memref<1x128xf32, #tpu.memory_space<vmem>>, vector<1x128xf32>
    %47 = vector.shape_cast %46 : vector<1x128xf32> to vector<1x1x128xf32>
    %48 = vector.broadcast %47 : vector<1x1x128xf32> to vector<8x8x128xf32>
    %49 = arith.addf %45, %48 : vector<8x8x128xf32>
    %50 = arith.negf %49 : vector<8x8x128xf32>
    %51 = math.exp %50 : vector<8x8x128xf32>
    %cst_25 = arith.constant 1.000000e+00 : f32
    %52 = vector.broadcast %cst_25 : f32 to vector<8x8x128xf32>
    %53 = arith.addf %52, %51 : vector<8x8x128xf32>
    %54 = arith.divf %52, %53 : vector<8x8x128xf32>
    %55 = vector.shape_cast %54 : vector<8x8x128xf32> to vector<1x8x8x128xf32>
    %c0_26 = arith.constant 0 : index
    %c0_27 = arith.constant 0 : index
    %c0_28 = arith.constant 0 : index
    %c0_29 = arith.constant 0 : index
    %56 = vector.load %arg6[%c0_26, %c0_27, %c0_28, %c0_29] : memref<1x8x8x128xf32, #tpu.memory_space<vmem>>, vector<1x8x8x128xf32>
    tpu.vector_store %arg6[%c0_26, %c0_27, %c0_28, %c0_29], %55 {strides = array<i32>} : memref<1x8x8x128xf32, #tpu.memory_space<vmem>>, vector<1x8x8x128xf32>,
    return
  }
  func.func @transform_0(%arg0: i32, %arg1: i32) -> (i32, i32, i32, i32) {
    %c0_i32 = arith.constant 0 : i32
    %c0_i32_0 = arith.constant 0 : i32
    %c0_i32_1 = arith.constant 0 : i32
    %c0_i32_2 = arith.constant 0 : i32
    return %arg0, %c0_i32, %c0_i32_0, %c0_i32_1 : i32, i32, i32, i32
  }
  func.func @transform_1(%arg0: i32, %arg1: i32) -> (i32, i32) {
    %c0_i32 = arith.constant 0 : i32
    %c0_i32_0 = arith.constant 0 : i32
    %c0_i32_1 = arith.constant 0 : i32
    return %c0_i32, %c0_i32_0 : i32, i32
  }
  func.func @transform_2(%arg0: i32, %arg1: i32) -> (i32, i32) {
    %c0_i32 = arith.constant 0 : i32
    %c0_i32_0 = arith.constant 0 : i32
    %c0_i32_1 = arith.constant 0 : i32
    return %c0_i32, %c0_i32_0 : i32, i32
  }
  func.func @transform_3(%arg0: i32, %arg1: i32) -> (i32, i32) {
    %c0_i32 = arith.constant 0 : i32
    %c0_i32_0 = arith.constant 0 : i32
    %c0_i32_1 = arith.constant 0 : i32
    return %c0_i32, %c0_i32_0 : i32, i32
  }
  func.func @transform_4(%arg0: i32, %arg1: i32) -> (i32, i32, i32, i32) {
    %c0_i32 = arith.constant 0 : i32
    %c0_i32_0 = arith.constant 0 : i32
    %c0_i32_1 = arith.constant 0 : i32
    return %arg0, %arg1, %c0_i32, %c0_i32_0 : i32, i32, i32, i32
  }
}

</mosaic_0001>

<bundles_post_ra>
// kernel: _lambda_.3
= control target key start
LH: loop header
LB: loop body
LE: loop exit
PB: predicated region body
PF: predicated region fallthrough
CT: control target
= control target key end

     0   :  { %s377_s1 = inlined_call_operand.vmem [shape: bf16[128,256], index: 1, kind: input, shape index: {}]   ;;  %s378_s0 = inlined_call_operand.vmem [shape: bf16[16,128], index: 0, kind: input, shape index: {}]   ;;  %s379_s2 = inlined_call_operand.vmem [shape: f32[1,256], index: 2, kind: input, shape index: {}]   ;;  %s380_s3 = inlined_call_operand.vmem [shape: bf16[16,256], index: 3, kind: output, shape index: {}]  }
   0x1   :  { %v226_v0 = vld [vmem:[%s377_s1 + $0x70] sm:$0xf]  ;;  %v248_v1 = vld [vmem:[%s377_s1 + $0x74] sm:$0xf0]  ;;  %v247_v2 = vld [vmem:[%s377_s1 + $0x74] sm:$0xf] }
   0x2   :  { %v227_v3 = vor.u32 %v248_v1, %v226_v0  ;;  %v228_v4 = vld [vmem:[%s377_s1 + $0x78] sm:$0xf0]  ;;  %v218_v5 = vld [vmem:[%s377_s1 + $0x60] sm:$0xf]  ;;  %v246_v6 = vld [vmem:[%s377_s1 + $0x64] sm:$0xf0] }
   0x3   :  { %v231_v7 = vor.u32 %v247_v2, %v228_v4  ;;  %v245_v8 = vld [vmem:[%s377_s1 + $0x64] sm:$0xf]  ;;  %v220_v9 = vld [vmem:[%s377_s1 + $0x68] sm:$0xf0]  ;;  %v219_v10 = vor.u32 %v246_v6, %v218_v5  ;;  %v210_v12 = vld [vmem:[%s377_s1 + $0x50] sm:$0xf] }
   0x4   :  { %124 = vmatpush.bf16.msra.mxu0 %v227_v3  ;;  %v223_v11 = vor.u32 %v245_v8, %v220_v9  ;;  %v244_v13 = vld [vmem:[%s377_s1 + $0x54] sm:$0xf0]  ;;  %v243_v14 = vld [vmem:[%s377_s1 + $0x54] sm:$0xf]  ;;  %v212_v15 = vld [vmem:[%s377_s1 + $0x58] sm:$0xf0] }
   0x5   :  { %138 = vmatpush.bf16.msra.mxu1 %v231_v7  ;;  %v211_v16 = vor.u32 %v244_v13, %v210_v12  ;;  %v215_v17 = vor.u32 %v243_v14, %v212_v15  ;;  %v202_v18 = vld [vmem:[%s377_s1 + $0x40] sm:$0xf]  ;;  %v242_v19 = vld [vmem:[%s377_s1 + $0x44] sm:$0xf0]  ;;  %v241_v20 = vld [vmem:[%s377_s1 + $0x44] sm:$0xf] }
   0x6   :  { %v204_v21 = vld [vmem:[%s377_s1 + $0x48] sm:$0xf0]  ;;  %v203_v22 = vor.u32 %v242_v19, %v202_v18  ;;  %v194_v24 = vld [vmem:[%s377_s1 + $0x30] sm:$0xf]  ;;  %v240_v25 = vld [vmem:[%s377_s1 + $0x34] sm:$0xf0] }
   0x7   :  { %v207_v23 = vor.u32 %v241_v20, %v204_v21  ;;  %v239_v26 = vld [vmem:[%s377_s1 + $0x34] sm:$0xf]  ;;  %v196_v27 = vld [vmem:[%s377_s1 + $0x38] sm:$0xf0]  ;;  %v195_v28 = vor.u32 %v240_v25, %v194_v24  ;;  %v186_v30 = vld [vmem:[%s377_s1 + $0x20] sm:$0xf] }
   0x8   :  { %125 = vmatpush.bf16.msra.mxu0 %v219_v10  ;;  %v199_v29 = vor.u32 %v239_v26, %v196_v27  ;;  %v238_v31 = vld [vmem:[%s377_s1 + $0x24] sm:$0xf0]  ;;  %v237_v32 = vld [vmem:[%s377_s1 + $0x24] sm:$0xf]  ;;  %v188_v33 = vld [vmem:[%s377_s1 + $0x28] sm:$0xf0] }
   0x9   :  { %139 = vmatpush.bf16.msra.mxu1 %v223_v11  ;;  %v187_v34 = vor.u32 %v238_v31, %v186_v30  ;;  %v191_v35 = vor.u32 %v237_v32, %v188_v33  ;;  %v178_v36 = vld [vmem:[%s377_s1 + $0x10] sm:$0xf]  ;;  %v236_v37 = vld [vmem:[%s377_s1 + $0x14] sm:$0xf0]  ;;  %v235_v38 = vld [vmem:[%s377_s1 + $0x14] sm:$0xf] }
   0xa   :  { %v180_v39 = vld [vmem:[%s377_s1 + $0x18] sm:$0xf0]  ;;  %v179_v40 = vor.u32 %v236_v37, %v178_v36  ;;  %v170_v42 = vld [vmem:[%s377_s1] sm:$0xf]  ;;  %v234_v43 = vld [vmem:[%s377_s1 + $0x4] sm:$0xf0] }
   0xb   :  { %v183_v41 = vor.u32 %v235_v38, %v180_v39  ;;  %v233_v44 = vld [vmem:[%s377_s1 + $0x4] sm:$0xf]  ;;  %v172_v45 = vld [vmem:[%s377_s1 + $0x8] sm:$0xf0]  ;;  %v171_v46 = vor.u32 %v234_v43, %v170_v42  ;;  %v32_v49 = vld [vmem:[%s379_s2] sm:$0x3] }
   0xc   :  { %126 = vmatpush.bf16.msra.mxu0 %v211_v16  ;;  %v175_v47 = vor.u32 %v233_v44, %v172_v45  ;;  %v232_v48 = vld [vmem:[%s378_s0] sm:$0xff]  ;;  %v34_v50 = vperm.slane %v32_v49, 0  ;;  %v35_v51 = vperm.slane %v32_v49, 1 }
   0xd   :  { %140 = vmatpush.bf16.msra.mxu1 %v215_v17 }
  0x10   :  { %127 = vmatpush.bf16.msra.mxu0 %v203_v22 }
  0x11   :  { %141 = vmatpush.bf16.msra.mxu1 %v207_v23 }
  0x14   :  { %128 = vmatpush.bf16.msra.mxu0 %v195_v28 }
  0x15   :  { %142 = vmatpush.bf16.msra.mxu1 %v199_v29 }
  0x18   :  { %129 = vmatpush.bf16.msra.mxu0 %v187_v34 }
  0x19   :  { %143 = vmatpush.bf16.msra.mxu1 %v191_v35 }
  0x1c   :  { %130 = vmatpush.bf16.msra.mxu0 %v179_v40 }
  0x1d   :  { %144 = vmatpush.bf16.msra.mxu1 %v183_v41 }
  0x20   :  { %131 = vmatpush.bf16.msra.mxu0 %v171_v46 }
  0x21   :  { %145 = vmatpush.bf16.msra.mxu1 %v175_v47 }
  0x23   :  { %132 = vmatmul.bf16.vlgmr.msra.gmra.mxu0 %v232_v48 }
  0x24   :  { %146 = vmatmul.bf16.vlgmr.msra.gmra.mxu1 %v232_v48 }
  0xa0   :  { %v133_v52 = vpop.f32.mrf.mxu0 }
  0xa1   :  { %v134_v53 = vadd.f32 %v133_v52, %v34_v50  ;;  %v147_v54 = vpop.f32.mrf.mxu1 }
  0xa2   :  { %v148_v55 = vadd.f32 %v147_v54, %v35_v51 }
  0xa3   :  { %v152_v56 = vmax.f32 %v134_v53, 0.0 }
  0xa4   :  { %v153_v57 = vmax.f32 %v148_v55, 0.0 }
  0xa6   :  { %v156_v58 = vpack.c.bf16 %v153_v57, %v152_v56 }
  0xa8   :  { %158 = vst [vmem:[%s380_s3] sm:$0xff] %v156_v58  ;;  %v135_v59 = vpop.f32.mrf.mxu0 }
  0xa9   :  { %v136_v60 = vadd.f32 %v135_v59, %v34_v50  ;;  %v149_v61 = vpop.f32.mrf.mxu1 }
  0xaa   :  { %v150_v62 = vadd.f32 %v149_v61, %v35_v51 }
  0xab   :  { %v154_v63 = vmax.f32 %v136_v60, 0.0 }
  0xac   :  { %v155_v0 = vmax.f32 %v150_v62, 0.0 }
  0xae   :  { %v157_v1 = vpack.c.bf16 %v155_v0, %v154_v63 }
  0xb0   :  { %159 = vst [vmem:[%s380_s3 + $0x8] sm:$0xff] %v157_v1 }

// kernel: _lambda_.4
= control target key start
LH: loop header
LB: loop body
LE: loop exit
PB: predicated region body
PF: predicated region fallthrough
CT: control target
= control target key end

     0   :  { %s867_s15 = smov 0   ;;  %s869_s16 = smov 0   ;;  %s956_s0 = inlined_call_operand.vmem [shape: bf16[2,5,5,16], index: 0, kind: input, shape index: {}]   ;;  %s957_s1 = inlined_call_operand.vmem [shape: bf16[64,128], index: 1, kind: input, shape index: {}]   ;;  %s958_s2 = inlined_call_operand.vmem [shape: f32[1,128], index: 2, kind: input, shape index: {}]   ;;  %s959_s3 = inlined_call_operand.vmem [shape: f32[1,128], index: 3, kind: input, shape index: {}]   ;;  %s960_s4 = inlined_call_operand.vmem [shape: bf16[2,4,4,128], index: 4, kind: output, shape index: {}]  }
   0x1   :  { %s871_s17 = smov 0  }
   0x2 LB: > { %s26_s18 = sadd.s32 1, %s836_s16  ;;  %p740_p0 = scmp.ge.s32.totalorder %s840_s17, 1  ;;  %s840_s17 = sphi %s871_s17, %s14_s17   ;;  %s836_s16 = sphi %s869_s16, %s962_s16   ;;  %s832_s15 = sphi %s867_s15, %s961_s15  }
   0x3   : > { %p28_p1 = scmp.ge.s32.totalorder %s26_s18, 2  ;;  %p176_p2 = scmp.lt.s32.totalorder %s840_s17, 3 }
   0x5   : > { %s964_s18 = smov (%p28_p1, %s26_s18), 0  ;;  %p177_p3 = pnand %p740_p0, %p176_p2 }
   0x6   : > { %p206_p4 = scmp.lt.s32.totalorder (!%p177_p3), %s832_s15, 1 }
   0x7   : > { %180 = sbr.rel (%p177_p3) target bundleno = 220 (0xdc), region = 36 }
   0xc   : > { %v788_v0 = vld [vmem:[%s957_s1 + $0x8] sm:$0xff]  ;;  %v787_v1 = vld [vmem:[%s957_s1] sm:$0xff]  ;;  %s966_s15 = smov (!%p206_p4, %s832_s15), 1  ;;  %vm253_vm0 = vcmask 130048   ;;  %v789_v28 = vld [vmem:[%s957_s1 + $0x10] sm:$0xff] }
   0xd   : > { %264 = vmatpush.bf16.msra.mxu0 %v788_v0  ;;  %290 = vmatpush.bf16.msra.mxu1 %v788_v0  ;;  %s791_s23 = smul.u32 20, %s966_s15  ;;  %v790_v35 = vld [vmem:[%s957_s1 + $0x18] sm:$0xff]  ;;  %s786_s9 = sshll.u32 %s966_s15, 3 }
   0xe   : > { %316 = vmatpush.bf16.msra.mxu2 %v788_v0  ;;  %342 = vmatpush.bf16.msra.mxu3 %v788_v0  ;;  %s219_s12 = scalar_lea.vmem %s960_s4, %s786_s9 }
   0xf   : > { %s897_s26 = scalar_lea.vmem %s956_s0, %s791_s23 }
  0x10   : > { %v231_v2 = vld [vmem:[%s897_s26] sm:$0x7]  ;;  %v232_v3 = vld [vmem:[%s897_s26 + $0x4] sm:$0x7]  ;;  %v233_v4 = vld [vmem:[%s897_s26 + $0x8] sm:$0x7] }
  0x11   : > { %364 = vmatpush.bf16.msrb.mxu0 %v787_v1  ;;  %380 = vmatpush.bf16.msrb.mxu1 %v787_v1  ;;  %v238_v5 = vunpack.c.l.b16 %v231_v2  ;;  %v271_v6 = vunpack.c.l.b16 %v232_v3  ;;  %v297_v7 = vunpack.c.l.b16 %v233_v4  ;;  %v234_v8 = vld [vmem:[%s897_s26 + $0xc] sm:$0x7]  ;;  %v225_v31 = vld [vmem:[%s897_s26] sm:$0x3]  ;;  %v226_v32 = vld [vmem:[%s897_s26 + $0x4] sm:$0x3] }
  0x12   : > { %396 = vmatpush.bf16.msrb.mxu2 %v787_v1  ;;  %412 = vmatpush.bf16.msrb.mxu3 %v787_v1  ;;  %v323_v9 = vunpack.c.l.b16 %v234_v8  ;;  %v227_v33 = vld [vmem:[%s897_s26 + $0x8] sm:$0x3]  ;;  %v228_v34 = vld [vmem:[%s897_s26 + $0xc] sm:$0x3]  ;;  %v772_v36 = vld [vmem:[%s897_s26 + $0x4] sm:$0x7] }
  0x13   : > { %v239_v10 = vpack.c.b16 %v238_v5, %v238_v5  ;;  %v272_v11 = vpack.c.b16 %v271_v6, %v271_v6  ;;  %v298_v12 = vpack.c.b16 %v297_v7, %v297_v7  ;;  %v773_v37 = vld [vmem:[%s897_s26 + $0x8] sm:$0x7]  ;;  %v774_v38 = vld [vmem:[%s897_s26 + $0xc] sm:$0x7]  ;;  %v775_v39 = vld [vmem:[%s897_s26 + $0x10] sm:$0x7]  ;;  %v508_v40 = vunpack.c.l.b16 %v772_v36 }
  0x14   : > { %v324_v13 = vpack.c.b16 %v323_v9, %v323_v9  ;;  %v540_v41 = vunpack.c.l.b16 %v773_v37  ;;  %v760_v42 = vld [vmem:[%s897_s26 + $0x4] sm:$0x3]  ;;  %v761_v43 = vld [vmem:[%s897_s26 + $0x8] sm:$0x3]  ;;  %v566_v44 = vunpack.c.l.b16 %v774_v38  ;;  %v592_v45 = vunpack.c.l.b16 %v775_v39  ;;  %v762_v46 = vld [vmem:[%s897_s26 + $0xc] sm:$0x3] }
  0x15   : > { %v241_v14 = vshrl.u32 %v239_v10, 16  ;;  %v243_v15 = vshll.u32 %v239_v10, 16  ;;  %v274_v16 = vshrl.u32 %v272_v11, 16  ;;  %v276_v17 = vshll.u32 %v272_v11, 16  ;;  %v763_v47 = vld [vmem:[%s897_s26 + $0x10] sm:$0x3] }
  0x16   : > { %v300_v18 = vshrl.u32 %v298_v12, 16  ;;  %v302_v19 = vshll.u32 %v298_v12, 16  ;;  %v326_v20 = vshrl.u32 %v324_v13, 16  ;;  %v328_v21 = vshll.u32 %v324_v13, 16  ;;  %v817_v38 = vld [vmem:[%s959_s3] ss:$0 sm:$0xff] }
  0x17   : > { %v245_v22 = vrot.slane %v243_v15, 1  ;;  %v278_v23 = vrot.slane %v276_v17, 1  ;;  %v509_v48 = vpack.c.b16 %v508_v40, %v508_v40  ;;  %v541_v49 = vpack.c.b16 %v540_v41, %v540_v41 }
  0x18   : > { %v304_v24 = vrot.slane %v302_v19, 1  ;;  %v330_v25 = vrot.slane %v328_v21, 1  ;;  %v567_v50 = vpack.c.b16 %v566_v44, %v566_v44  ;;  %v593_v51 = vpack.c.b16 %v592_v45, %v592_v45 }
  0x19   : > { %v246_v26 = vor.u32 %v245_v22, %v241_v14  ;;  %v279_v27 = vor.u32 %v278_v23, %v274_v16  ;;  %v513_v52 = vshll.u32 %v509_v48, 16  ;;  %v545_v53 = vshll.u32 %v541_v49, 16 }
  0x1a   : > { %v305_v29 = vor.u32 %v304_v24, %v300_v18  ;;  %v331_v30 = vor.u32 %v330_v25, %v326_v20  ;;  %v571_v54 = vshll.u32 %v567_v50, 16  ;;  %v597_v55 = vshll.u32 %v593_v51, 16 }
  0x1b   : > { %748 = vmatmul.msk.bf16.vlgmr.msra.gmra.mxu0 %vm253_vm0, %v246_v26  ;;  %749 = vmatmul.msk.bf16.vlgmr.msra.gmra.mxu1 %vm253_vm0, %v279_v27  ;;  %v511_v56 = vshrl.u32 %v509_v48, 16  ;;  %v515_v57 = vrot.slane %v513_v52, 1  ;;  %v543_v58 = vshrl.u32 %v541_v49, 16  ;;  %v547_v59 = vrot.slane %v545_v53, 1 }
  0x1c   : > { %750 = vmatmul.msk.bf16.vlgmr.msra.gmra.mxu2 %vm253_vm0, %v305_v29  ;;  %751 = vmatmul.msk.bf16.vlgmr.msra.gmra.mxu3 %vm253_vm0, %v331_v30  ;;  %v569_v60 = vshrl.u32 %v567_v50, 16  ;;  %v573_v61 = vrot.slane %v571_v54, 1  ;;  %v595_v62 = vshrl.u32 %v593_v51, 16  ;;  %v599_v63 = vrot.slane %v597_v55, 1 }
  0x1d   : > { %475 = vmatpush.bf16.msra.mxu2 %v789_v28  ;;  %491 = vmatpush.bf16.msra.mxu3 %v789_v28  ;;  %v516_v0 = vor.u32 %v515_v57, %v511_v56  ;;  %v548_v1 = vor.u32 %v547_v59, %v543_v58 }
  0x1e   : > { %443 = vmatpush.bf16.msra.mxu0 %v789_v28  ;;  %459 = vmatpush.bf16.msra.mxu1 %v789_v28  ;;  %v574_v2 = vor.u32 %v573_v61, %v569_v60  ;;  %v600_v3 = vor.u32 %v599_v63, %v595_v62 }
  0x2b   : > { %756 = vmatmul.msk.bf16.vlgmr.msrb.gmra.mxu0 %vm253_vm0, %v225_v31  ;;  %757 = vmatmul.msk.bf16.vlgmr.msrb.gmra.mxu1 %vm253_vm0, %v226_v32  ;;  %v816_v32 = vld [vmem:[%s958_s2] ss:$0 sm:$0xff] }
  0x2c   : > { %758 = vmatmul.msk.bf16.vlgmr.msrb.gmra.mxu2 %vm253_vm0, %v227_v33  ;;  %759 = vmatmul.msk.bf16.vlgmr.msrb.gmra.mxu3 %vm253_vm0, %v228_v34 }
  0x2d   : > { %585 = vmatpush.bf16.msrb.mxu2 %v790_v35  ;;  %611 = vmatpush.bf16.msrb.mxu3 %v790_v35 }
  0x2e   : > { %533 = vmatpush.bf16.msrb.mxu0 %v790_v35  ;;  %559 = vmatpush.bf16.msrb.mxu1 %v790_v35 }
  0x3b   : > { %768 = vmatmul.msk.bf16.vlgmr.msra.gmra.mxu0 %vm253_vm0, %v760_v42  ;;  %769 = vmatmul.msk.bf16.vlgmr.msra.gmra.mxu1 %vm253_vm0, %v761_v43 }
  0x3c   : > { %770 = vmatmul.msk.bf16.vlgmr.msra.gmra.mxu2 %vm253_vm0, %v762_v46  ;;  %771 = vmatmul.msk.bf16.vlgmr.msra.gmra.mxu3 %vm253_vm0, %v763_v47 }
  0x4b   : > { %780 = vmatmul.msk.bf16.vlgmr.msrb.gmra.mxu0 %vm253_vm0, %v516_v0  ;;  %781 = vmatmul.msk.bf16.vlgmr.msrb.gmra.mxu1 %vm253_vm0, %v548_v1 }
  0x4c   : > { %782 = vmatmul.msk.bf16.vlgmr.msrb.gmra.mxu2 %vm253_vm0, %v574_v2  ;;  %783 = vmatmul.msk.bf16.vlgmr.msrb.gmra.mxu3 %vm253_vm0, %v600_v3 }
  0x98   : > { %v266_v4 = vpop.f32.mrf.mxu0  ;;  %v292_v5 = vpop.f32.mrf.mxu1 }
  0x9f   : > { %v318_v6 = vpop.f32.mrf.mxu2  ;;  %v344_v7 = vpop.f32.mrf.mxu3 }
  0xa0   : > { %v268_v8 = vpop.f32.mrf.mxu0  ;;  %v294_v9 = vpop.f32.mrf.mxu1 }
  0xa7   : > { %v320_v10 = vpop.f32.mrf.mxu2  ;;  %v346_v11 = vpop.f32.mrf.mxu3 }
  0xa8   : > { %v366_v12 = vpop.f32.mrf.mxu0  ;;  %v382_v13 = vpop.f32.mrf.mxu1 }
  0xa9   : > { %v367_v26 = vadd.f32 %v366_v12, %v266_v4  ;;  %v383_v27 = vadd.f32 %v382_v13, %v292_v5 }
  0xaf   : > { %v398_v14 = vpop.f32.mrf.mxu2  ;;  %v414_v15 = vpop.f32.mrf.mxu3 }
  0xb0   : > { %v368_v16 = vpop.f32.mrf.mxu0  ;;  %v384_v17 = vpop.f32.mrf.mxu1  ;;  %v399_v40 = vadd.f32 %v398_v14, %v318_v6  ;;  %v415_v41 = vadd.f32 %v414_v15, %v344_v7 }
  0xb7   : > { %v400_v18 = vpop.f32.mrf.mxu2  ;;  %v416_v19 = vpop.f32.mrf.mxu3 }
  0xb8   : > { %v445_v20 = vpop.f32.mrf.mxu0  ;;  %v461_v21 = vpop.f32.mrf.mxu1 }
  0xb9   : > { %v497_v28 = vadd.f32 %v445_v20, %v367_v26  ;;  %v498_v29 = vadd.f32 %v461_v21, %v383_v27 }
  0xbf   : > { %v477_v22 = vpop.f32.mrf.mxu2  ;;  %v493_v23 = vpop.f32.mrf.mxu3 }
  0xc0   : > { %v447_v24 = vpop.f32.mrf.mxu0  ;;  %v463_v25 = vpop.f32.mrf.mxu1  ;;  %v499_v44 = vadd.f32 %v477_v22, %v399_v40  ;;  %v500_v45 = vadd.f32 %v493_v23, %v415_v41 }
  0xc7   : > { %v479_v30 = vpop.f32.mrf.mxu2  ;;  %v495_v31 = vpop.f32.mrf.mxu3 }
  0xc8   : > { %v535_v33 = vpop.f32.mrf.mxu0  ;;  %v561_v34 = vpop.f32.mrf.mxu1 }
  0xc9   : > { %v617_v35 = vadd.f32 %v535_v33, %v497_v28  ;;  %v618_v36 = vadd.f32 %v561_v34, %v498_v29 }
  0xcb   : > { %v625_v37 = vadd.f32 %v816_v32, %v617_v35  ;;  %v626_v39 = vadd.f32 %v816_v32, %v618_v36 }
  0xcd   : > { %v629_v42 = vmax.f32 %v625_v37, 0.0  ;;  %v630_v43 = vmax.f32 %v626_v39, 0.0 }
  0xcf   : > { %v637_v46 = vadd.f32 %v817_v38, %v629_v42  ;;  %v638_v47 = vadd.f32 %v817_v38, %v630_v43  ;;  %v587_v48 = vpop.f32.mrf.mxu2  ;;  %v613_v49 = vpop.f32.mrf.mxu3 }
  0xd0   : > { %v619_v50 = vadd.f32 %v587_v48, %v499_v44  ;;  %v620_v51 = vadd.f32 %v613_v49, %v500_v45  ;;  %v537_v52 = vpop.f32.mrf.mxu0  ;;  %v563_v53 = vpop.f32.mrf.mxu1 }
  0xd1   : > { %v641_v54 = vpack.c.bf16 %v637_v46, %v637_v46  ;;  %v642_v55 = vpack.c.bf16 %v638_v47, %v638_v47 }
  0xd2   : > { %v627_v56 = vadd.f32 %v816_v32, %v619_v50  ;;  %v628_v57 = vadd.f32 %v816_v32, %v620_v51 }
  0xd3   : > { %645 = vst [vmem:[%s219_s12] sm:$0x3] %v641_v54 }
  0xd4   : > { %646 = vst [vmem:[%s219_s12 + $0x2] sm:$0x3] %v642_v55  ;;  %v631_v58 = vmax.f32 %v627_v56, 0.0  ;;  %v632_v59 = vmax.f32 %v628_v57, 0.0 }
  0xd6   : > { %v639_v60 = vadd.f32 %v817_v38, %v631_v58  ;;  %v640_v61 = vadd.f32 %v817_v38, %v632_v59 }
  0xd7   : > { %v589_v62 = vpop.f32.mrf.mxu2  ;;  %v615_v63 = vpop.f32.mrf.mxu3 }
  0xd8   : > { %v643_v0 = vpack.c.bf16 %v639_v60, %v639_v60  ;;  %v644_v1 = vpack.c.bf16 %v640_v61, %v640_v61 }
  0xda   : > { %647 = vst [vmem:[%s219_s12 + $0x4] sm:$0x3] %v643_v0 }
  0xdb   : > { %648 = vst [vmem:[%s219_s12 + $0x6] sm:$0x3] %v644_v1 }
  0xdc PF: > { %s14_s17 = sadd.s32 1, %s840_s17   ;;  %s961_s15 = smov %s836_s16 }
  0xdd   : > { %p11_p5 = scmp.ge.s32.totalorder %s14_s17, 4   ;;  %s962_s16 = smov %s964_s18 }
  0xdf   :  { %13 = sbr.rel (!%p11_p5) target bundleno = 2 (0x2), region = 68 }

// kernel: _lambda_.5
= control target key start
LH: loop header
LB: loop body
LE: loop exit
PB: predicated region body
PF: predicated region fallthrough
CT: control target
= control target key end

     0   :  { %s1550_s15 = smov 0   ;;  %s1552_s16 = smov 0   ;;  %s1775_s0 = inlined_call_operand.vmem [shape: bf16[2,9,9,8], index: 0, kind: input, shape index: {}]   ;;  %s1776_s1 = inlined_call_operand.vmem [shape: bf16[32,128], index: 1, kind: input, shape index: {}]   ;;  %s1777_s2 = inlined_call_operand.vmem [shape: f32[1,128], index: 2, kind: input, shape index: {}]   ;;  %s1778_s3 = inlined_call_operand.vmem [shape: f32[1,128], index: 3, kind: input, shape index: {}]   ;;  %s1779_s4 = inlined_call_operand.vmem [shape: f32[2,8,8,128], index: 4, kind: output, shape index: {}]  }
   0x1   :  { %s1554_s17 = smov 0  }
   0x2 LB: > { %s26_s18 = sadd.s32 1, %s1519_s16  ;;  %p1291_p0 = scmp.ge.s32.totalorder %s1523_s17, 1  ;;  %s1523_s17 = sphi %s1554_s17, %s14_s17   ;;  %s1519_s16 = sphi %s1552_s16, %s1785_s16   ;;  %s1515_s15 = sphi %s1550_s15, %s1784_s15  }
   0x3   : > { %p28_p1 = scmp.ge.s32.totalorder %s26_s18, 2  ;;  %p176_p2 = scmp.lt.s32.totalorder %s1523_s17, 3 }
   0x5   : > { %s1787_s18 = smov (%p28_p1, %s26_s18), 0  ;;  %p177_p3 = pnand %p1291_p0, %p176_p2 }
   0x6   : > { %p206_p4 = scmp.lt.s32.totalorder (!%p177_p3), %s1515_s15, 1 }
   0x7   : > { %180 = sbr.rel (%p177_p3) target bundleno = 310 (0x136), region = 36 }
   0xc   : > { %v251_v0 = vld [vmem:[%s1776_s1 + $0x4] sm:$0xf]  ;;  %vm268_vm0 = vcmask 1043456   ;;  %s1789_s15 = smov (!%p206_p4, %s1515_s15), 1  ;;  %v234_v16 = vld [vmem:[%s1776_s1] sm:$0xf] }
   0xd   : > { %v270_v1 = vsel %vm268_vm0, %v251_v0, 0  ;;  %s1442_s21 = smul.u32 72, %s1789_s15  ;;  %vm264_vm1 = vcmask 64512   ;;  %v485_v38 = vsel %vm268_vm0, %v234_v16, 0  ;;  %v624_v60 = vld [vmem:[%s1776_s1 + $0x8] sm:$0xf] }
   0xe   : > { %279 = vmatpush.bf16.msra.mxu0 %v270_v1  ;;  %307 = vmatpush.bf16.msra.mxu1 %v270_v1  ;;  %s1425_s9 = sshll.u32 %s1789_s15, 6 }
   0xf   : > { %335 = vmatpush.bf16.msra.mxu2 %v270_v1  ;;  %363 = vmatpush.bf16.msra.mxu3 %v270_v1  ;;  %s1578_s24 = scalar_lea.vmem %s1775_s0, %s1442_s21  ;;  %s1735_s12 = scalar_lea.vmem %s1779_s4, %s1425_s9 }
  0x10   : > { %v1297_v2 = vld [vmem:[%s1578_s24] sm:$0xf]  ;;  %v1426_v3 = vld [vmem:[%s1578_s24] sm:$0x10]  ;;  %v1302_v4 = vld [vmem:[%s1578_s24 + $0x8] sm:$0xf] }
  0x11   : > { %v1298_v5 = vor.u32 %v1426_v3, %v1297_v2  ;;  %v1427_v6 = vld [vmem:[%s1578_s24 + $0x8] sm:$0x10]  ;;  %v1307_v7 = vld [vmem:[%s1578_s24 + $0x10] sm:$0xf]  ;;  %v1428_v8 = vld [vmem:[%s1578_s24 + $0x10] sm:$0x10] }
  0x12   : > { %391 = vmatpush.bf16.msrb.mxu0 %v270_v1  ;;  %419 = vmatpush.bf16.msrb.mxu1 %v270_v1  ;;  %v1303_v9 = vor.u32 %v1427_v6, %v1302_v4  ;;  %v1308_v10 = vor.u32 %v1428_v8, %v1307_v7  ;;  %v1312_v11 = vld [vmem:[%s1578_s24 + $0x18] sm:$0xf]  ;;  %v1429_v12 = vld [vmem:[%s1578_s24 + $0x18] sm:$0x10]  ;;  %v1317_v21 = vld [vmem:[%s1578_s24 + $0x20] sm:$0xf] }
  0x13   : > { %447 = vmatpush.bf16.msrb.mxu2 %v270_v1  ;;  %475 = vmatpush.bf16.msrb.mxu3 %v270_v1  ;;  %v258_v13 = vshrl.u32 %v1298_v5, 16  ;;  %v260_v14 = vshll.u32 %v1298_v5, 16  ;;  %v1313_v15 = vor.u32 %v1429_v12, %v1312_v11  ;;  %v1430_v25 = vld [vmem:[%s1578_s24 + $0x20] sm:$0x10]  ;;  %v1322_v28 = vld [vmem:[%s1578_s24 + $0x28] sm:$0xf] }
  0x14   : > { %v291_v17 = vshrl.u32 %v1303_v9, 16  ;;  %v293_v18 = vshll.u32 %v1303_v9, 16  ;;  %v319_v19 = vshrl.u32 %v1308_v10, 16  ;;  %v321_v20 = vshll.u32 %v1308_v10, 16  ;;  %v1431_v29 = vld [vmem:[%s1578_s24 + $0x28] sm:$0x10] }
  0x15   : > { %v262_v22 = vrot.slane %v260_v14, 1  ;;  %v347_v23 = vshrl.u32 %v1313_v15, 16  ;;  %v349_v24 = vshll.u32 %v1313_v15, 16  ;;  %v1327_v32 = vld [vmem:[%s1578_s24 + $0x30] sm:$0xf]  ;;  %v1318_v40 = vor.u32 %v1430_v25, %v1317_v21 }
  0x16   : > { %v295_v26 = vrot.slane %v293_v18, 1  ;;  %v323_v27 = vrot.slane %v321_v20, 1  ;;  %v1432_v33 = vld [vmem:[%s1578_s24 + $0x30] sm:$0x10]  ;;  %v1332_v36 = vld [vmem:[%s1578_s24 + $0x38] sm:$0xf]  ;;  %v1323_v41 = vor.u32 %v1431_v29, %v1322_v28 }
  0x17   : > { %v263_v30 = vor.u32 %v262_v22, %v258_v13  ;;  %v351_v31 = vrot.slane %v349_v24, 1  ;;  %v1433_v37 = vld [vmem:[%s1578_s24 + $0x38] sm:$0x10]  ;;  %v1328_v42 = vor.u32 %v1432_v33, %v1327_v32  ;;  %v377_v44 = vshll.u32 %v1318_v40, 16  ;;  %v226_v61 = vld [vmem:[%s1578_s24] sm:$0xf] }
  0x18   : > { %v296_v34 = vor.u32 %v295_v26, %v291_v17  ;;  %v324_v35 = vor.u32 %v323_v27, %v319_v19  ;;  %v1333_v43 = vor.u32 %v1433_v37, %v1332_v36  ;;  %v405_v45 = vshll.u32 %v1323_v41, 16  ;;  %v227_v62 = vld [vmem:[%s1578_s24 + $0x8] sm:$0xf]  ;;  %v228_v63 = vld [vmem:[%s1578_s24 + $0x10] sm:$0xf] }
  0x19   : > { %1299 = vmatmul.msk.bf16.vlgmr.msra.gmra.mxu0 %vm264_vm1, %v263_v30  ;;  %v352_v39 = vor.u32 %v351_v31, %v347_v23  ;;  %v433_v46 = vshll.u32 %v1328_v42, 16  ;;  %v375_v48 = vshrl.u32 %v1318_v40, 16  ;;  %v379_v49 = vrot.slane %v377_v44, 1  ;;  %v229_v0 = vld [vmem:[%s1578_s24 + $0x18] sm:$0xf] }
  0x1a   : > { %1304 = vmatmul.msk.bf16.vlgmr.msra.gmra.mxu1 %vm264_vm1, %v296_v34  ;;  %1309 = vmatmul.msk.bf16.vlgmr.msra.gmra.mxu2 %vm264_vm1, %v324_v35  ;;  %v461_v47 = vshll.u32 %v1333_v43, 16  ;;  %v403_v50 = vshrl.u32 %v1323_v41, 16  ;;  %v407_v51 = vrot.slane %v405_v45, 1  ;;  %v431_v52 = vshrl.u32 %v1328_v42, 16  ;;  %v230_v2 = vld [vmem:[%s1578_s24 + $0x20] sm:$0xf] }
  0x1b   : > { %1314 = vmatmul.msk.bf16.vlgmr.msra.gmra.mxu3 %vm264_vm1, %v352_v39  ;;  %526 = vmatpush.bf16.msra.mxu2 %v485_v38  ;;  %v435_v53 = vrot.slane %v433_v46, 1  ;;  %v459_v54 = vshrl.u32 %v1333_v43, 16  ;;  %v380_v56 = vor.u32 %v379_v49, %v375_v48  ;;  %v629_v1 = vsel %vm268_vm0, %v624_v60, 0  ;;  %v231_v3 = vld [vmem:[%s1578_s24 + $0x28] sm:$0xf] }
  0x1c   : > { %542 = vmatpush.bf16.msra.mxu3 %v485_v38  ;;  %494 = vmatpush.bf16.msra.mxu0 %v485_v38  ;;  %v463_v55 = vrot.slane %v461_v47, 1  ;;  %v408_v57 = vor.u32 %v407_v51, %v403_v50  ;;  %v232_v4 = vld [vmem:[%s1578_s24 + $0x30] sm:$0xf]  ;;  %v233_v5 = vld [vmem:[%s1578_s24 + $0x38] sm:$0xf] }
  0x1d   : > { %510 = vmatpush.bf16.msra.mxu1 %v485_v38  ;;  %v436_v58 = vor.u32 %v435_v53, %v431_v52  ;;  %v780_v6 = vld [vmem:[%s1776_s1 + $0xc] sm:$0xf]  ;;  %v1343_v7 = vld [vmem:[%s1578_s24 + $0x8] sm:$0xf]  ;;  %v1344_v8 = vld [vmem:[%s1578_s24 + $0x10] sm:$0xf] }
  0x1e   : > { %v464_v59 = vor.u32 %v463_v55, %v459_v54  ;;  %v1345_v9 = vld [vmem:[%s1578_s24 + $0x18] sm:$0xf]  ;;  %v1346_v10 = vld [vmem:[%s1578_s24 + $0x20] sm:$0xf]  ;;  %v797_v11 = vsel %vm268_vm0, %v780_v6, 0 }
  0x1f   : > { %v1347_v12 = vld [vmem:[%s1578_s24 + $0x28] sm:$0xf]  ;;  %v1348_v13 = vld [vmem:[%s1578_s24 + $0x30] sm:$0xf]  ;;  %v1349_v14 = vld [vmem:[%s1578_s24 + $0x38] sm:$0xf] }
  0x20   : > { %v1377_v15 = vld [vmem:[%s1578_s24 + $0x8] sm:$0xf]  ;;  %v1434_v16 = vld [vmem:[%s1578_s24 + $0x8] sm:$0x10]  ;;  %v1382_v17 = vld [vmem:[%s1578_s24 + $0x10] sm:$0xf] }
  0x21   : > { %v1435_v18 = vld [vmem:[%s1578_s24 + $0x10] sm:$0x10]  ;;  %v1387_v19 = vld [vmem:[%s1578_s24 + $0x18] sm:$0xf]  ;;  %v1436_v20 = vld [vmem:[%s1578_s24 + $0x18] sm:$0x10]  ;;  %v1378_v24 = vor.u32 %v1434_v16, %v1377_v15 }
  0x22   : > { %v1350_v21 = vld [vmem:[%s1578_s24 + $0x40] sm:$0xf]  ;;  %v1437_v23 = vld [vmem:[%s1578_s24 + $0x20] sm:$0x10]  ;;  %v1383_v25 = vor.u32 %v1435_v18, %v1382_v17  ;;  %v1388_v26 = vor.u32 %v1436_v20, %v1387_v19  ;;  %v1397_v43 = vld [vmem:[%s1578_s24 + $0x28] sm:$0xf] }
  0x23   : > { %v1392_v22 = vld [vmem:[%s1578_s24 + $0x20] sm:$0xf]  ;;  %v789_v28 = vshll.u32 %v1378_v24, 16  ;;  %v787_v32 = vshrl.u32 %v1378_v24, 16  ;;  %v1438_v44 = vld [vmem:[%s1578_s24 + $0x28] sm:$0x10] }
  0x24   : > { %v1393_v27 = vor.u32 %v1437_v23, %v1392_v22  ;;  %v820_v29 = vshll.u32 %v1383_v25, 16  ;;  %v848_v30 = vshll.u32 %v1388_v26, 16  ;;  %v818_v34 = vshrl.u32 %v1383_v25, 16  ;;  %v1402_v45 = vld [vmem:[%s1578_s24 + $0x30] sm:$0xf] }
  0x25   : > { %v791_v33 = vrot.slane %v789_v28, 1  ;;  %v846_v36 = vshrl.u32 %v1388_v26, 16  ;;  %v1439_v47 = vld [vmem:[%s1578_s24 + $0x30] sm:$0x10]  ;;  %v1407_v48 = vld [vmem:[%s1578_s24 + $0x38] sm:$0xf]  ;;  %v1398_v52 = vor.u32 %v1438_v44, %v1397_v43 }
  0x26   : > { %v876_v31 = vshll.u32 %v1393_v27, 16  ;;  %v822_v35 = vrot.slane %v820_v29, 1  ;;  %v850_v37 = vrot.slane %v848_v30, 1  ;;  %v1440_v49 = vld [vmem:[%s1578_s24 + $0x38] sm:$0x10]  ;;  %v1403_v53 = vor.u32 %v1439_v47, %v1402_v45 }
  0x27   : > { %v792_v40 = vor.u32 %v791_v33, %v787_v32  ;;  %v1412_v50 = vld [vmem:[%s1578_s24 + $0x40] sm:$0xf]  ;;  %v1441_v51 = vld [vmem:[%s1578_s24 + $0x40] sm:$0x10]  ;;  %v1408_v54 = vor.u32 %v1440_v49, %v1407_v48  ;;  %v902_v60 = vshrl.u32 %v1398_v52, 16 }
  0x28   : > { %v878_v39 = vrot.slane %v876_v31, 1  ;;  %v823_v41 = vor.u32 %v822_v35, %v818_v34  ;;  %v851_v42 = vor.u32 %v850_v37, %v846_v36  ;;  %v1413_v55 = vor.u32 %v1441_v51, %v1412_v50 }
  0x29   : > { %1319 = vmatmul.msk.bf16.vlgmr.msrb.gmra.mxu0 %vm264_vm1, %v380_v56  ;;  %v904_v56 = vshll.u32 %v1398_v52, 16 }
  0x2a   : > { %1324 = vmatmul.msk.bf16.vlgmr.msrb.gmra.mxu1 %vm264_vm1, %v408_v57  ;;  %1329 = vmatmul.msk.bf16.vlgmr.msrb.gmra.mxu2 %vm264_vm1, %v436_v58  ;;  %v932_v57 = vshll.u32 %v1403_v53, 16  ;;  %v960_v58 = vshll.u32 %v1408_v54, 16 }
  0x2b   : > { %1334 = vmatmul.msk.bf16.vlgmr.msrb.gmra.mxu3 %vm264_vm1, %v464_v59  ;;  %590 = vmatpush.bf16.msrb.mxu2 %v485_v38  ;;  %v988_v59 = vshll.u32 %v1413_v55, 16 }
  0x2c   : > { %606 = vmatpush.bf16.msrb.mxu3 %v485_v38  ;;  %558 = vmatpush.bf16.msrb.mxu0 %v485_v38 }
  0x2d   : > { %574 = vmatpush.bf16.msrb.mxu1 %v485_v38  ;;  %v874_v38 = vshrl.u32 %v1393_v27, 16 }
  0x2f   : > { %v879_v46 = vor.u32 %v878_v39, %v874_v38 }
  0x39   : > { %1335 = vmatmul.msk.bf16.vlgmr.msra.gmra.mxu0 %vm264_vm1, %v226_v61  ;;  %v906_v61 = vrot.slane %v904_v56, 1 }
  0x3a   : > { %1336 = vmatmul.msk.bf16.vlgmr.msra.gmra.mxu1 %vm264_vm1, %v227_v62  ;;  %1337 = vmatmul.msk.bf16.vlgmr.msra.gmra.mxu2 %vm264_vm1, %v228_v63  ;;  %v930_v62 = vshrl.u32 %v1403_v53, 16  ;;  %v934_v63 = vrot.slane %v932_v57, 1 }
  0x3b   : > { %1338 = vmatmul.msk.bf16.vlgmr.msra.gmra.mxu3 %vm264_vm1, %v229_v0  ;;  %670 = vmatpush.bf16.msra.mxu2 %v629_v1  ;;  %v958_v0 = vshrl.u32 %v1408_v54, 16 }
  0x3c   : > { %686 = vmatpush.bf16.msra.mxu3 %v629_v1  ;;  %638 = vmatpush.bf16.msra.mxu0 %v629_v1 }
  0x3d   : > { %654 = vmatpush.bf16.msra.mxu1 %v629_v1 }
  0x49   : > { %1339 = vmatmul.msk.bf16.vlgmr.msrb.gmra.mxu0 %vm264_vm1, %v230_v2  ;;  %v986_v2 = vshrl.u32 %v1413_v55, 16 }
  0x4a   : > { %1340 = vmatmul.msk.bf16.vlgmr.msrb.gmra.mxu1 %vm264_vm1, %v231_v3  ;;  %1341 = vmatmul.msk.bf16.vlgmr.msrb.gmra.mxu2 %vm264_vm1, %v232_v4  ;;  %v990_v3 = vrot.slane %v988_v59, 1  ;;  %v907_v4 = vor.u32 %v906_v61, %v902_v60 }
  0x4b   : > { %1342 = vmatmul.msk.bf16.vlgmr.msrb.gmra.mxu3 %vm264_vm1, %v233_v5  ;;  %734 = vmatpush.bf16.msrb.mxu2 %v629_v1  ;;  %v935_v5 = vor.u32 %v934_v63, %v930_v62  ;;  %v1685_v62 = vld [vmem:[%s1777_s2] ss:$0 sm:$0xff] }
  0x4c   : > { %750 = vmatpush.bf16.msrb.mxu3 %v629_v1  ;;  %702 = vmatpush.bf16.msrb.mxu0 %v629_v1 }
  0x4d   : > { %718 = vmatpush.bf16.msrb.mxu1 %v629_v1  ;;  %v962_v1 = vrot.slane %v960_v58, 1 }
  0x4f   : > { %v963_v6 = vor.u32 %v962_v1, %v958_v0 }
  0x59   : > { %1351 = vmatmul.msk.bf16.vlgmr.msra.gmra.mxu0 %vm264_vm1, %v1343_v7  ;;  %v991_v7 = vor.u32 %v990_v3, %v986_v2  ;;  %v1690_v3 = vld [vmem:[%s1778_s3] ss:$0 sm:$0xff] }
  0x5a   : > { %1352 = vmatmul.msk.bf16.vlgmr.msra.gmra.mxu1 %vm264_vm1, %v1344_v8  ;;  %1353 = vmatmul.msk.bf16.vlgmr.msra.gmra.mxu2 %vm264_vm1, %v1345_v9 }
  0x5b   : > { %1354 = vmatmul.msk.bf16.vlgmr.msra.gmra.mxu3 %vm264_vm1, %v1346_v10  ;;  %862 = vmatpush.bf16.msra.mxu2 %v797_v11 }
  0x5c   : > { %890 = vmatpush.bf16.msra.mxu3 %v797_v11  ;;  %806 = vmatpush.bf16.msra.mxu0 %v797_v11 }
  0x5d   : > { %834 = vmatpush.bf16.msra.mxu1 %v797_v11 }
  0x69   : > { %1355 = vmatmul.msk.bf16.vlgmr.msrb.gmra.mxu0 %vm264_vm1, %v1347_v12 }
  0x6a   : > { %1356 = vmatmul.msk.bf16.vlgmr.msrb.gmra.mxu1 %vm264_vm1, %v1348_v13  ;;  %1357 = vmatmul.msk.bf16.vlgmr.msrb.gmra.mxu2 %vm264_vm1, %v1349_v14 }
  0x6b   : > { %1358 = vmatmul.msk.bf16.vlgmr.msrb.gmra.mxu3 %vm264_vm1, %v1350_v21  ;;  %974 = vmatpush.bf16.msrb.mxu2 %v797_v11 }
  0x6c   : > { %1002 = vmatpush.bf16.msrb.mxu3 %v797_v11  ;;  %918 = vmatpush.bf16.msrb.mxu0 %v797_v11 }
  0x6d   : > { %946 = vmatpush.bf16.msrb.mxu1 %v797_v11 }
  0x79   : > { %1379 = vmatmul.msk.bf16.vlgmr.msra.gmra.mxu0 %vm264_vm1, %v792_v40 }
  0x7a   : > { %1384 = vmatmul.msk.bf16.vlgmr.msra.gmra.mxu1 %vm264_vm1, %v823_v41  ;;  %1389 = vmatmul.msk.bf16.vlgmr.msra.gmra.mxu2 %vm264_vm1, %v851_v42 }
  0x7b   : > { %1394 = vmatmul.msk.bf16.vlgmr.msra.gmra.mxu3 %vm264_vm1, %v879_v46 }
  0x89   : > { %1399 = vmatmul.msk.bf16.vlgmr.msrb.gmra.mxu0 %vm264_vm1, %v907_v4 }
  0x8a   : > { %1404 = vmatmul.msk.bf16.vlgmr.msrb.gmra.mxu1 %vm264_vm1, %v935_v5  ;;  %1409 = vmatmul.msk.bf16.vlgmr.msrb.gmra.mxu2 %vm264_vm1, %v963_v6 }
  0x8b   : > { %1414 = vmatmul.msk.bf16.vlgmr.msrb.gmra.mxu3 %vm264_vm1, %v991_v7 }
  0x96   : > { %v281_v8 = vpop.f32.mrf.mxu0 }
  0x97   : > { %v309_v9 = vpop.f32.mrf.mxu1 }
  0x9d   : > { %v337_v10 = vpop.f32.mrf.mxu2 }
  0x9e   : > { %v365_v11 = vpop.f32.mrf.mxu3  ;;  %v283_v12 = vpop.f32.mrf.mxu0 }
  0x9f   : > { %v311_v13 = vpop.f32.mrf.mxu1 }
  0xa5   : > { %v339_v14 = vpop.f32.mrf.mxu2 }
  0xa6   : > { %v367_v15 = vpop.f32.mrf.mxu3  ;;  %v393_v16 = vpop.f32.mrf.mxu0 }
  0xa7   : > { %v421_v17 = vpop.f32.mrf.mxu1 }
  0xad   : > { %v449_v18 = vpop.f32.mrf.mxu2 }
  0xae   : > { %v477_v19 = vpop.f32.mrf.mxu3  ;;  %v395_v20 = vpop.f32.mrf.mxu0 }
  0xaf   : > { %v423_v21 = vpop.f32.mrf.mxu1 }
  0xb5   : > { %v451_v22 = vpop.f32.mrf.mxu2 }
  0xb6   : > { %v479_v23 = vpop.f32.mrf.mxu3  ;;  %v496_v24 = vpop.f32.mrf.mxu0 }
  0xb7   : > { %v512_v25 = vpop.f32.mrf.mxu1  ;;  %v497_v58 = vadd.f32 %v496_v24, %v281_v8 }
  0xb8   : > { %v513_v59 = vadd.f32 %v512_v25, %v309_v9 }
  0xbd   : > { %v528_v26 = vpop.f32.mrf.mxu2 }
  0xbe   : > { %v544_v27 = vpop.f32.mrf.mxu3  ;;  %v498_v28 = vpop.f32.mrf.mxu0  ;;  %v529_v7 = vadd.f32 %v528_v26, %v337_v10 }
  0xbf   : > { %v514_v29 = vpop.f32.mrf.mxu1  ;;  %v545_v9 = vadd.f32 %v544_v27, %v365_v11 }
  0xc5   : > { %v530_v30 = vpop.f32.mrf.mxu2 }
  0xc6   : > { %v546_v31 = vpop.f32.mrf.mxu3  ;;  %v560_v32 = vpop.f32.mrf.mxu0 }
  0xc7   : > { %v561_v33 = vadd.f32 %v560_v32, %v393_v16  ;;  %v576_v34 = vpop.f32.mrf.mxu1 }
  0xc8   : > { %v1672_v35 = vadd.f32 %v576_v34, %v421_v17 }
  0xcd   : > { %v592_v36 = vpop.f32.mrf.mxu2 }
  0xce   : > { %v1674_v37 = vadd.f32 %v592_v36, %v449_v18  ;;  %v608_v38 = vpop.f32.mrf.mxu3  ;;  %v562_v39 = vpop.f32.mrf.mxu0 }
  0xcf   : > { %v1676_v40 = vadd.f32 %v608_v38, %v477_v19  ;;  %v578_v41 = vpop.f32.mrf.mxu1 }
  0xd5   : > { %v594_v42 = vpop.f32.mrf.mxu2 }
  0xd6   : > { %v610_v43 = vpop.f32.mrf.mxu3  ;;  %v640_v44 = vpop.f32.mrf.mxu0 }
  0xd7   : > { %v656_v45 = vpop.f32.mrf.mxu1  ;;  %v756_v60 = vadd.f32 %v640_v44, %v497_v58 }
  0xd8   : > { %v757_v63 = vadd.f32 %v656_v45, %v513_v59 }
  0xdd   : > { %v672_v46 = vpop.f32.mrf.mxu2 }
  0xde   : > { %v688_v47 = vpop.f32.mrf.mxu3  ;;  %v642_v48 = vpop.f32.mrf.mxu0  ;;  %v758_v13 = vadd.f32 %v672_v46, %v529_v7 }
  0xdf   : > { %v658_v49 = vpop.f32.mrf.mxu1  ;;  %v759_v15 = vadd.f32 %v688_v47, %v545_v9 }
  0xe5   : > { %v674_v50 = vpop.f32.mrf.mxu2 }
  0xe6   : > { %v690_v51 = vpop.f32.mrf.mxu3  ;;  %v704_v52 = vpop.f32.mrf.mxu0 }
  0xe7   : > { %v720_v53 = vpop.f32.mrf.mxu1  ;;  %v760_v28 = vadd.f32 %v704_v52, %v561_v33 }
  0xe8   : > { %v761_v42 = vadd.f32 %v720_v53, %v1672_v35 }
  0xed   : > { %v1678_v54 = vpop.f32.mrf.mxu2 }
  0xee   : > { %v1680_v55 = vpop.f32.mrf.mxu3  ;;  %v706_v56 = vpop.f32.mrf.mxu0  ;;  %v762_v51 = vadd.f32 %v1678_v54, %v1674_v37 }
  0xef   : > { %v722_v57 = vpop.f32.mrf.mxu1 }
  0xf5   : > { %v738_v61 = vpop.f32.mrf.mxu2 }
  0xf6   : > { %v754_v0 = vpop.f32.mrf.mxu3  ;;  %v808_v1 = vpop.f32.mrf.mxu0 }
  0xf7   : > { %v1008_v2 = vadd.f32 %v808_v1, %v756_v60  ;;  %v836_v4 = vpop.f32.mrf.mxu1 }
  0xf8   : > { %v1009_v5 = vadd.f32 %v836_v4, %v757_v63  ;;  %v763_v63 = vadd.f32 %v1680_v55, %v1676_v40 }
  0xf9   : > { %v1020_v6 = vadd.f32 %v1685_v62, %v1008_v2 }
  0xfa   : > { %v1021_v8 = vadd.f32 %v1685_v62, %v1009_v5 }
  0xfb   : > { %v1032_v12 = vadd.f32 %v1690_v3, %v1020_v6 }
  0xfc   : > { %v1033_v14 = vadd.f32 %v1690_v3, %v1021_v8 }
  0xfd   : > { %v1415_v16 = vmul.f32 -1.442695, %v1032_v12  ;;  %v864_v17 = vpop.f32.mrf.mxu2 }
  0xfe   : > { %v1416_v18 = vmul.f32 -1.442695, %v1033_v14  ;;  %v1010_v19 = vadd.f32 %v864_v17, %v758_v13  ;;  %v892_v20 = vpop.f32.mrf.mxu3  ;;  %v810_v21 = vpop.f32.mrf.mxu0 }
  0xff   : > { %1469 = vpow2.f32 %v1415_v16  ;;  %v1011_v22 = vadd.f32 %v892_v20, %v759_v15  ;;  %v838_v23 = vpop.f32.mrf.mxu1 }
 0x100   : > { %1471 = vpow2.f32 %v1416_v18  ;;  %v1022_v10 = vadd.f32 %v1685_v62, %v1010_v19 }
 0x101   : > { %v1023_v11 = vadd.f32 %v1685_v62, %v1011_v22 }
 0x102   : > { %v1034_v24 = vadd.f32 %v1690_v3, %v1022_v10 }
 0x103   : > { %v1035_v25 = vadd.f32 %v1690_v3, %v1023_v11 }
 0x104   : > { %v1417_v26 = vmul.f32 -1.442695, %v1034_v24 }
 0x105   : > { %v1470_v27 = vpop.eup %1469  ;;  %v1418_v29 = vmul.f32 -1.442695, %v1035_v25  ;;  %v866_v30 = vpop.f32.mrf.mxu2 }
 0x106   : > { %v1472_v31 = vpop.eup %1471  ;;  %v1064_v32 = vadd.f32 1.0, %v1470_v27  ;;  %1473 = vpow2.f32 %v1417_v26  ;;  %v894_v34 = vpop.f32.mrf.mxu3 }
 0x107   : > { %v920_v36 = vpop.f32.mrf.mxu0  ;;  %v1700_v38 = vadd.f32 1.0, %v1472_v31  ;;  %1475 = vpow2.f32 %v1418_v29  ;;  %v948_v41 = vpop.f32.mrf.mxu1 }
 0x108   : > { %v1012_v39 = vadd.f32 %v920_v36, %v760_v28  ;;  %1477 = vrcp.f32 %v1064_v32  ;;  %v1013_v33 = vadd.f32 %v948_v41, %v761_v42  ;;  %v1081_v35 = vand.u32 2147483647, %v1064_v32 }
 0x109   : > { %1479 = vrcp.f32 %v1700_v38  ;;  %vm1077_vm2 = vweird.f32 %v1064_v32  ;;  %v1083_v1 = vand.u32 2147483648, %v1064_v32  ;;  %v1096_v2 = vand.u32 2147483647, %v1700_v38 }
 0x10a   : > { %v1024_v43 = vadd.f32 %v1685_v62, %v1012_v39  ;;  %v1025_v46 = vadd.f32 %v1685_v62, %v1013_v33  ;;  %vm1720_vm3 = vcmp.eq.f32.partialorder %v1081_v35, 8.507059e+37  ;;  %vm1092_vm4 = vweird.f32 %v1700_v38 }
 0x10b   : > { %v1098_v6 = vand.u32 2147483648, %v1700_v38  ;;  %v1084_v14 = vor.u32 1.1754944e-38, %v1083_v1  ;;  %vm1728_vm7 = vcmp.eq.f32.partialorder %v1096_v2, 8.507059e+37 }
 0x10c   : > { %v1474_v44 = vpop.eup %1473  ;;  %v1036_v45 = vadd.f32 %v1690_v3, %v1024_v43  ;;  %v1037_v60 = vadd.f32 %v1690_v3, %v1025_v46 }
 0x10d   : > { %v1476_v47 = vpop.eup %1475  ;;  %v1707_v48 = vadd.f32 1.0, %v1474_v44  ;;  %v976_v49 = vpop.f32.mrf.mxu2  ;;  %v1099_v18 = vor.u32 1.1754944e-38, %v1098_v6 }
 0x10e   : > { %v1478_v50 = vpop.eup %1477  ;;  %v1711_v52 = vadd.f32 1.0, %v1476_v47  ;;  %v1004_v53 = vpop.f32.mrf.mxu3  ;;  %v1419_v59 = vmul.f32 -1.442695, %v1036_v45  ;;  %v1014_v54 = vadd.f32 %v976_v49, %v762_v51  ;;  %v1420_v55 = vmul.f32 -1.442695, %v1037_v60 }
 0x10f   : > { %v922_v56 = vpop.f32.mrf.mxu0  ;;  %v1480_v57 = vpop.eup %1479  ;;  %v1073_v58 = vmul.f32 %v1478_v50, %v1064_v32  ;;  %1481 = vrcp.f32 %v1707_v48  ;;  %vm1078_vm5 = vweird.f32 %v1478_v50  ;;  %v1015_v9 = vadd.f32 %v1004_v53, %v763_v63 }
 0x110   : > { %v950_v61 = vpop.f32.mrf.mxu1  ;;  %v1088_v37 = vmul.f32 %v1480_v57, %v1700_v38  ;;  %1483 = vrcp.f32 %v1711_v52  ;;  %vm1093_vm6 = vweird.f32 %v1480_v57  ;;  %v1026_v8 = vadd.f32 %v1685_v62, %v1014_v54  ;;  %vm1079_vm8 = vmor %vm1077_vm2, %vm1078_vm5 }
 0x111   : > { %v1074_v0 = vsub.f32 1.0, %v1073_v58  ;;  %1485 = vpow2.f32 %v1419_v59  ;;  %vm1094_vm9 = vmor %vm1092_vm4, %vm1093_vm6  ;;  %vm1107_vm10 = vweird.f32 %v1707_v48  ;;  %v1111_v10 = vand.u32 2147483647, %v1707_v48 }
 0x112   : > { %v1089_v5 = vsub.f32 1.0, %v1088_v37  ;;  %1487 = vpow2.f32 %v1420_v55  ;;  %v1038_v20 = vadd.f32 %v1690_v3, %v1026_v8  ;;  %v1027_v11 = vadd.f32 %v1685_v62, %v1015_v9 }
 0x113   : > { %v1075_v40 = vmul.f32 %v1478_v50, %v1074_v0  ;;  %v1113_v30 = vand.u32 2147483648, %v1707_v48  ;;  %v1126_v39 = vand.u32 2147483647, %v1711_v52  ;;  %v1128_v41 = vand.u32 2147483648, %v1711_v52 }
 0x114   : > { %v1090_v7 = vmul.f32 %v1480_v57, %v1089_v5  ;;  %v1421_v31 = vmul.f32 -1.442695, %v1038_v20  ;;  %v1039_v32 = vadd.f32 %v1690_v3, %v1027_v11  ;;  %vm1112_vm14 = vcmp.eq.f32.partialorder %v1111_v10, 8.507059e+37 }
 0x115   : > { %v1482_v12 = vpop.eup %1481  ;;  %v1076_v13 = vadd.f32 %v1478_v50, %v1075_v40  ;;  %v978_v16 = vpop.f32.mrf.mxu2  ;;  %v1114_v3 = vor.u32 1.1754944e-38, %v1113_v30  ;;  %vm1122_vm15 = vweird.f32 %v1711_v52  ;;  %v1129_v49 = vor.u32 1.1754944e-38, %v1128_v41 }
 0x116   : > { %v1091_v17 = vadd.f32 %v1480_v57, %v1090_v7  ;;  %v1103_v19 = vmul.f32 %v1482_v12, %v1707_v48  ;;  %v1006_v21 = vpop.f32.mrf.mxu3  ;;  %v1484_v22 = vpop.eup %1483  ;;  %vm1108_vm11 = vweird.f32 %v1482_v12  ;;  %1489 = vpow2.f32 %v1421_v31 }
 0x117   : > { %v1080_v23 = vsel %vm1079_vm8, %v1478_v50, %v1076_v13  ;;  %v1118_v27 = vmul.f32 %v1484_v22, %v1711_v52  ;;  %v1486_v28 = vpop.eup %1485  ;;  %v1422_v42 = vmul.f32 -1.442695, %v1039_v32  ;;  %vm1123_vm12 = vweird.f32 %v1484_v22  ;;  %vm1109_vm13 = vmor %vm1107_vm10, %vm1108_vm11 }
 0x118   : > { %v1085_v24 = vsel %vm1720_vm3, %v1084_v14, %v1080_v23  ;;  %v1095_v25 = vsel %vm1094_vm9, %v1480_v57, %v1091_v17  ;;  %v1104_v26 = vsub.f32 1.0, %v1103_v19  ;;  %v1068_v36 = vadd.f32 1.0, %v1486_v28  ;;  %v1488_v38 = vpop.eup %1487  ;;  %vm1124_vm0 = vmor %vm1122_vm15, %vm1123_vm12 }
 0x119   : > { %1192 = vst [vmem:[%s1735_s12] sm:$0xff] %v1085_v24  ;;  %v1100_v29 = vsel %vm1728_vm7, %v1099_v18, %v1095_v25  ;;  %v1119_v62 = vsub.f32 1.0, %v1118_v27  ;;  %v1069_v44 = vadd.f32 1.0, %v1488_v38  ;;  %vm1127_vm1 = vcmp.eq.f32.partialorder %v1126_v39, 8.507059e+37 }
 0x11a   : > { %1193 = vst [vmem:[%s1735_s12 + $0x8] sm:$0xff] %v1100_v29  ;;  %v1105_v34 = vmul.f32 %v1482_v12, %v1104_v26  ;;  %1491 = vrcp.f32 %v1068_v36  ;;  %v1143_v61 = vand.u32 2147483648, %v1068_v36  ;;  %v1141_v37 = vand.u32 2147483647, %v1068_v36 }
 0x11b   : > { %v1120_v33 = vmul.f32 %v1484_v22, %v1119_v62  ;;  %1493 = vpow2.f32 %v1422_v42  ;;  %vm1137_vm3 = vweird.f32 %v1068_v36  ;;  %v1158_v1 = vand.u32 2147483648, %v1069_v44 }
 0x11c   : > { %v1106_v43 = vadd.f32 %v1482_v12, %v1105_v34  ;;  %1495 = vrcp.f32 %v1069_v44  ;;  %v1490_v51 = vpop.eup %1489  ;;  %v1144_v4 = vor.u32 1.1754944e-38, %v1143_v61  ;;  %v1156_v6 = vand.u32 2147483647, %v1069_v44 }
 0x11d   : > { %v1121_v46 = vadd.f32 %v1484_v22, %v1120_v33  ;;  %v1070_v53 = vadd.f32 1.0, %v1490_v51  ;;  %vm1142_vm6 = vcmp.eq.f32.partialorder %v1141_v37, 8.507059e+37  ;;  %vm1152_vm7 = vweird.f32 %v1069_v44 }
 0x11e   : > { %v1110_v45 = vsel %vm1109_vm13, %v1482_v12, %v1106_v43  ;;  %v1159_v12 = vor.u32 1.1754944e-38, %v1158_v1  ;;  %vm1157_vm9 = vcmp.eq.f32.partialorder %v1156_v6, 8.507059e+37 }
 0x11f   : > { %v1115_v47 = vsel %vm1112_vm14, %v1114_v3, %v1110_v45  ;;  %v1125_v50 = vsel %vm1124_vm0, %v1484_v22, %v1121_v46  ;;  %1497 = vrcp.f32 %v1070_v53  ;;  %v1173_v15 = vand.u32 2147483648, %v1070_v53 }
 0x120   : > { %1194 = vst [vmem:[%s1735_s12 + $0x10] sm:$0xff] %v1115_v47  ;;  %v1130_v35 = vsel %vm1127_vm1, %v1129_v49, %v1125_v50  ;;  %v1492_v48 = vpop.eup %1491  ;;  %v1171_v19 = vand.u32 2147483647, %v1070_v53  ;;  %vm1167_vm11 = vweird.f32 %v1070_v53 }
 0x121   : > { %1195 = vst [vmem:[%s1735_s12 + $0x18] sm:$0xff] %v1130_v35  ;;  %v1494_v56 = vpop.eup %1493  ;;  %v1133_v57 = vmul.f32 %v1492_v48, %v1068_v36  ;;  %vm1138_vm2 = vweird.f32 %v1492_v48  ;;  %v1174_v23 = vor.u32 1.1754944e-38, %v1173_v15 }
 0x122   : > { %v1496_v58 = vpop.eup %1495  ;;  %v1071_v60 = vadd.f32 1.0, %v1494_v56  ;;  %vm1139_vm4 = vmor %vm1137_vm3, %vm1138_vm2  ;;  %vm1172_vm14 = vcmp.eq.f32.partialorder %v1171_v19, 8.507059e+37 }
 0x123   : > { %v1134_v59 = vsub.f32 1.0, %v1133_v57  ;;  %v1148_v52 = vmul.f32 %v1496_v58, %v1069_v44  ;;  %vm1153_vm5 = vweird.f32 %v1496_v58 }
 0x124   : > { %1499 = vrcp.f32 %v1071_v60  ;;  %vm1154_vm8 = vmor %vm1152_vm7, %vm1153_vm5  ;;  %v1188_v22 = vand.u32 2147483648, %v1071_v60  ;;  %v1186_v11 = vand.u32 2147483647, %v1071_v60  ;;  %vm1182_vm15 = vweird.f32 %v1071_v60 }
 0x125   : > { %v1135_v63 = vmul.f32 %v1492_v48, %v1134_v59  ;;  %v1149_v54 = vsub.f32 1.0, %v1148_v52  ;;  %v1498_v2 = vpop.eup %1497 }
 0x126   : > { %v1163_v55 = vmul.f32 %v1498_v2, %v1070_v53  ;;  %vm1168_vm10 = vweird.f32 %v1498_v2  ;;  %v1189_v27 = vor.u32 1.1754944e-38, %v1188_v22  ;;  %vm1187_vm1 = vcmp.eq.f32.partialorder %v1186_v11, 8.507059e+37 }
 0x127   : > { %v1136_v0 = vadd.f32 %v1492_v48, %v1135_v63  ;;  %v1150_v5 = vmul.f32 %v1496_v58, %v1149_v54  ;;  %vm1169_vm12 = vmor %vm1167_vm11, %vm1168_vm10 }
 0x128   : > { %v1164_v13 = vsub.f32 1.0, %v1163_v55 }
 0x129   : > { %v1140_v40 = vsel %vm1139_vm4, %v1492_v48, %v1136_v0  ;;  %v1151_v8 = vadd.f32 %v1496_v58, %v1150_v5 }
 0x12a   : > { %v1145_v7 = vsel %vm1142_vm6, %v1144_v4, %v1140_v40  ;;  %v1500_v9 = vpop.eup %1499  ;;  %v1165_v18 = vmul.f32 %v1498_v2, %v1164_v13 }
 0x12b   : > { %1196 = vst [vmem:[%s1735_s12 + $0x20] sm:$0xff] %v1145_v7  ;;  %v1155_v14 = vsel %vm1154_vm8, %v1496_v58, %v1151_v8  ;;  %v1178_v16 = vmul.f32 %v1500_v9, %v1071_v60  ;;  %vm1183_vm13 = vweird.f32 %v1500_v9 }
 0x12c   : > { %v1160_v17 = vsel %vm1157_vm9, %v1159_v12, %v1155_v14  ;;  %v1166_v21 = vadd.f32 %v1498_v2, %v1165_v18  ;;  %vm1184_vm0 = vmor %vm1182_vm15, %vm1183_vm13 }
 0x12d   : > { %1197 = vst [vmem:[%s1735_s12 + $0x28] sm:$0xff] %v1160_v17  ;;  %v1179_v20 = vsub.f32 1.0, %v1178_v16 }
 0x12e   : > { %v1170_v24 = vsel %vm1169_vm12, %v1498_v2, %v1166_v21 }
 0x12f   : > { %v1180_v10 = vmul.f32 %v1500_v9, %v1179_v20  ;;  %v1175_v25 = vsel %vm1172_vm14, %v1174_v23, %v1170_v24 }
 0x130   : > { %1198 = vst [vmem:[%s1735_s12 + $0x30] sm:$0xff] %v1175_v25 }
 0x131   : > { %v1181_v26 = vadd.f32 %v1500_v9, %v1180_v10 }
 0x133   : > { %v1185_v28 = vsel %vm1184_vm0, %v1500_v9, %v1181_v26 }
 0x134   : > { %v1190_v29 = vsel %vm1187_vm1, %v1189_v27, %v1185_v28 }
 0x135   : > { %1199 = vst [vmem:[%s1735_s12 + $0x38] sm:$0xff] %v1190_v29 }
 0x136 PF: > { %s14_s17 = sadd.s32 1, %s1523_s17   ;;  %s1784_s15 = smov %s1519_s16 }
 0x137   : > { %p11_p5 = scmp.ge.s32.totalorder %s14_s17, 4   ;;  %s1785_s16 = smov %s1787_s18 }
 0x139   :  { %13 = sbr.rel (!%p11_p5) target bundleno = 2 (0x2), region = 68 }

</bundles_post_ra>
